<compile_context>
chip_gen: v7x
topology: tpu7x:2x2x1
jax: 0.10.0
libtpu: 0.0.40
codegen_flags: <defaults>
</compile_context>

<pallas_src>
import functools

import jax
import jax.numpy as jnp
from jax import lax
from jax.experimental import pallas as pl
from jax.experimental.pallas import tpu as pltpu


def _round_up(v, m):
    return ((v + m - 1) // m) * m


def _vmem_capacity_bytes():
    """Physical VMEM per core (v5e/v6e: 128 MiB, v7x: 64 MiB); conservative fallback."""
    try:
        cap = int(pltpu.get_tpu_info().vmem_capacity_bytes)
        if cap > 0:
            return cap
    except Exception:
        pass
    return 64 * 1024 * 1024


def _invariant_spec(shape, single_buffer):
    """BlockSpec for a grid-invariant operand (constant index_map).

    single_buffer=True requests Buffered(1): double-buffering a constant-index
    operand only wastes VMEM (halves the resident weight footprint)."""
    index_map = lambda i: (0,) * len(shape)
    if single_buffer:
        return pl.BlockSpec(shape, index_map, pipeline_mode=pl.Buffered(1))
    return pl.BlockSpec(shape, index_map)


# --------------------------------------------------------------------------
# Kernel 1: flat 2-D slab (seg_num % win_size == 0, merge is a free reshape).
# --------------------------------------------------------------------------
def _slab_kernel(x_ref, w_ref, b_ref, o_ref, *, eps):
    # x_ref: (tm, D_in) merged rows | w_ref: (D_in, D_out) LN-folded weight
    # b_ref: (1, D_out) f32 folded bias | o_ref: (tm, D_out)
    x = x_ref[...].astype(jnp.float32)
    inv_d = jnp.float32(1.0 / x.shape[-1])
    mean = jnp.sum(x, axis=-1, keepdims=True) * inv_d
    xc = x - mean
    var = jnp.sum(xc * xc, axis=-1, keepdims=True) * inv_d      # two-pass LN
    xn = (xc * lax.rsqrt(var + eps)).astype(w_ref.dtype)        # rsqrt -> EUP
    out = jnp.dot(xn, w_ref[...], preferred_element_type=jnp.float32)
    o_ref[...] = (out + b_ref[...]).astype(o_ref.dtype)
    # NOTE: rows of a clipped (ragged) last block hold uninitialized data;
    # their results are dropped by output clipping.


# --------------------------------------------------------------------------
# Kernel 2: padded path.  Works on the copy-free flat (bt, seg_num*d_model)
# view and resolves the "repeat last pad_num segments" with STATIC indices,
# so the padded tensor is never materialized (single HBM pass).
# --------------------------------------------------------------------------
def _pad_merge_kernel(xf_ref, w_ref, b_ref, o_ref, *, eps, d_model, win_size,
                      seg_num, merged_num, pad_num):
    # xf_ref: (tb, seg_num*d_model) | w_ref: (win*d_model, D_out)
    # b_ref : (1, D_out) f32        | o_ref: (tb, merged_num*D_out)
    D = d_model
    d_out = o_ref.shape[-1] // merged_num
    inv_d = jnp.float32(1.0 / (win_size * D))
    bias = b_ref[...]                                   # hoisted out of the loop
    for j in range(merged_num):
        # torch.cat((x, x[:, :, -pad_num:, :]), dim=-2): padded index s >= seg_num
        # maps to s - pad_num.  All indices are static Python ints.
        segs = []
        for i in range(win_size):
            s = j * win_size + i
            segs.append(s if s < seg_num else s - pad_num)
        xs = [xf_ref[:, s * D:(s + 1) * D].astype(jnp.float32) for s in segs]
        tot = xs[0].sum(axis=-1, keepdims=True)
        for t in xs[1:]:
            tot = tot + t.sum(axis=-1, keepdims=True)
        mean = tot * inv_d
        sq = ((xs[0] - mean) ** 2).sum(axis=-1, keepdims=True)
        for t in xs[1:]:
            sq = sq + ((t - mean) ** 2).sum(axis=-1, keepdims=True)
        rstd = lax.rsqrt(sq * inv_d + eps)
        acc = None
        for i, t in enumerate(xs):
            xn = ((t - mean) * rstd).astype(w_ref.dtype)
            p = jnp.dot(xn, w_ref[i * D:(i + 1) * D, :],
                        preferred_element_type=jnp.float32)
            acc = p if acc is None else acc + p
        o_ref[:, j * d_out:(j + 1) * d_out] = (acc + bias).astype(o_ref.dtype)


# --------------------------------------------------------------------------
# Wrappers
# --------------------------------------------------------------------------
def _forward_nopad(x, w_fold, b2d, *, eps):
    B, T, S, D = x.shape
    D_in, D_out = w_fold.shape
    win = D_in // D
    M = S // win
    N = B * T * M
    x2d = x.reshape(N, D_in)           # contiguous, copy-free merged view

    in_b = jnp.dtype(x.dtype).itemsize
    w_b = jnp.dtype(w_fold.dtype).itemsize
    vmem_cap = _vmem_capacity_bytes()
    budget = int(vmem_cap * 0.7)
    fixed = D_in * D_out * w_b + D_out * 4 + (1 << 20)
    per_row = (2 * D_in * in_b          # double-buffered input tile
               + 2 * D_out * in_b       # double-buffered output tile
               + 3 * D_in * 4           # f32 intermediates (x, xc, xn)
               + 2 * D_out * 4)         # f32 matmul result
    tm = max(16, (budget - fixed) // per_row)
    tm = min(tm, 2048)                  # per-step overhead already amortized here
    if tm >= N:
        tm = N                          # single full tile on 1-TC chips
        if N >= 512:                    # split only when both halves stay >=256 rows
            tm = _round_up(pl.cdiv(N, 2), 16)   # feeds v7x's 2nd TensorCore
    else:
        tm = (tm // 16) * 16
    grid = (pl.cdiv(N, tm),)

    need = (2 * tm * D_in * in_b + 2 * tm * D_out * in_b
            + 2 * (D_in * D_out * w_b + D_out * 4)
            + tm * (3 * D_in + 2 * D_out) * 4 + (2 << 20))
    vmem_limit = int(min(vmem_cap, max(need, 16 * 1024 * 1024)))

    cost = pl.CostEstimate(
        flops=int(2 * N * D_in * D_out + 8 * N * D_in),
        transcendentals=int(N),
        bytes_accessed=int(N * D_in * in_b + N * D_out * in_b
                           + D_in * D_out * w_b + D_out * 4),
    )
    kernel = functools.partial(_slab_kernel, eps=eps)

    def call(single_buffer):
        return pl.pallas_call(
            kernel,
            out_shape=jax.ShapeDtypeStruct((N, D_out), x.dtype),
            grid_spec=pltpu.PrefetchScalarGridSpec(
                num_scalar_prefetch=0,
                grid=grid,
                in_specs=[
                    pl.BlockSpec((tm, D_in), lambda i: (i, 0)),
                    _invariant_spec((D_in, D_out), single_buffer),
                    _invariant_spec((1, D_out), single_buffer),
                ],
                out_specs=pl.BlockSpec((tm, D_out), lambda i: (i, 0)),
            ),
            compiler_params=pltpu.CompilerParams(
                dimension_semantics=("parallel",),
                vmem_limit_bytes=vmem_limit,
            ),
            cost_estimate=cost,
        )(x2d, w_fold, b2d)

    try:
        out2d = call(True)
    except Exception:      # pl.Buffered / pipeline_mode unsupported -> plain specs
        out2d = call(False)
    return out2d.reshape(B, T, M, D_out)


def _forward_pad(x, w_fold, b2d, *, win_size, pad_num, eps):
    B, T, S, D = x.shape
    BT = B * T
    D_in, D_out = w_fold.shape
    M = (S + pad_num) // win_size
    xf = x.reshape(BT, S * D)          # contiguous, copy-free flat view

    in_b = jnp.dtype(x.dtype).itemsize
    w_b = jnp.dtype(w_fold.dtype).itemsize
    vmem_cap = _vmem_capacity_bytes()
    budget = int(vmem_cap * 0.7)
    fixed = D_in * D_out * w_b + D_out * 4 + (1 << 20)
    per_row = (2 * S * D * in_b + 2 * M * D_out * in_b
               + 4 * win_size * D * 4 + 4 * D_out * 4)
    tb = max(8, (budget - fixed) // per_row)
    tb = min(tb, 1024)
    if tb >= BT:
        tb = BT
    else:
        tb = (tb // 8) * 8
    grid = (pl.cdiv(BT, tb),)

    need = (2 * tb * S * D * in_b + 2 * tb * M * D_out * in_b
            + 2 * (D_in * D_out * w_b + D_out * 4)
            + tb * (4 * win_size * D + 4 * D_out) * 4 + (2 << 20))
    vmem_limit = int(min(vmem_cap, max(need, 16 * 1024 * 1024)))

    cost = pl.CostEstimate(
        flops=int(2 * BT * M * D_in * D_out + 8 * BT * M * D_in),
        transcendentals=int(BT * M),
        bytes_accessed=int(BT * S * D * in_b + BT * M * D_out * in_b
                           + D_in * D_out * w_b + D_out * 4),
    )
    kernel = functools.partial(_pad_merge_kernel, eps=eps, d_model=D,
                               win_size=win_size, seg_num=S,
                               merged_num=M, pad_num=pad_num)

    def call(single_buffer):
        return pl.pallas_call(
            kernel,
            out_shape=jax.ShapeDtypeStruct((BT, M * D_out), x.dtype),
            grid_spec=pltpu.PrefetchScalarGridSpec(
                num_scalar_prefetch=0,
                grid=grid,
                in_specs=[
                    pl.BlockSpec((tb, S * D), lambda i: (i, 0)),
                    _invariant_spec((D_in, D_out), single_buffer),
                    _invariant_spec((1, D_out), single_buffer),
                ],
                out_specs=pl.BlockSpec((tb, M * D_out), lambda i: (i, 0)),
            ),
            compiler_params=pltpu.CompilerParams(
                dimension_semantics=("parallel",),
                vmem_limit_bytes=vmem_limit,
            ),
            cost_estimate=cost,
        )(xf, w_fold, b2d)

    try:
        out = call(True)
    except Exception:
        out = call(False)
    return out.reshape(B, T, M, D_out)


def seg_merging_forward(x, params, *, win_size, eps=1e-5):
    """x: (B, ts_d, seg_num, d_model) -> (B, ts_d, ceil(seg_num/win_size), d_model)."""
    gamma, beta, w, b = params["gamma"], params["beta"], params["w"], params["b"]
    B, T, S, D = x.shape
    D_in = win_size * D
    assert w.shape[0] == D_in
    D_out = w.shape[1]

    # Fold the LayerNorm affine into the linear layer:
    #   (xn*gamma + beta) @ W + b == xn @ (gamma[:,None]*W) + (beta @ W + b)
    w32 = w.astype(jnp.float32)
    w_fold = (gamma.astype(jnp.float32)[:, None] * w32).astype(w.dtype)
    b_fold = beta.astype(jnp.float32) @ w32 + b.astype(jnp.float32)

    # Lane-dense output stores: pad output columns to a multiple of 128, slice after.
    pad_cols = (-D_out) % 128
    if pad_cols:
        w_fold = jnp.pad(w_fold, ((0, 0), (0, pad_cols)))
        b_fold = jnp.pad(b_fold, ((0, pad_cols),))
    b2d = b_fold.reshape(1, -1)          # stays f32; added in f32 inside the kernel

    pad_num = (-S) % win_size
    if pad_num == 0:
        out = _forward_nopad(x, w_fold, b2d, eps=eps)
    else:
        out = _forward_pad(x, w_fold, b2d, win_size=win_size, pad_num=pad_num, eps=eps)
    if pad_cols:
        out = out[..., :D_out]
    return out


def init_params(key, d_model, win_size, dtype=jnp.float32):
    """Deterministic parameter init (shapes from SegMerging.__init__)."""
    # TODO(synk): BBBLinear weight sampling / KL term not reproduced; posterior-mean weights only.
    D_in = win_size * d_model
    k_w, k_b, k_g, k_e = jax.random.split(key, 4)
    w = (jax.random.normal(k_w, (D_in, d_model)) * 0.02).astype(dtype)   # (in, out)
    b = (jax.random.normal(k_b, (d_model,)) * 0.02).astype(dtype)
    # LayerNorm default init is ones/zeros; perturbed here so the affine-folding
    # path is actually exercised by the check below.
    gamma = (1.0 + 0.1 * jax.random.normal(k_g, (D_in,))).astype(dtype)
    beta = (0.05 * jax.random.normal(k_e, (D_in,))).astype(dtype)
    return {"w": w, "b": b, "gamma": gamma, "beta": beta}


def _reference_forward(x, params, *, win_size, eps=1e-5):
    """Pure-JAX reference mirroring the PyTorch forward."""
    B, T, S, D = x.shape
    pad_num = S % win_size
    if pad_num != 0:
        pad_num = win_size - pad_num
        x = jnp.concatenate([x, x[:, :, -pad_num:, :]], axis=-2)
    segs = [x[:, :, i::win_size, :] for i in range(win_size)]
    x = jnp.concatenate(segs, axis=-1)
    mean = jnp.mean(x, axis=-1, keepdims=True)
    var = jnp.mean((x - mean) ** 2, axis=-1, keepdims=True)
    xn = (x - mean) / jnp.sqrt(var + eps)
    y = xn * params["gamma"] + params["beta"]
    return jnp.dot(y, params["w"], precision=jax.lax.Precision.HIGHEST) + params["b"]


if __name__ == "__main__":
    B, ts_d, d_model, win_size = 2, 4, 128, 2
    key = jax.random.PRNGKey(0)
    k_x, k_x2, k_p = jax.random.split(key, 3)
    params = init_params(k_p, d_model, win_size)

    # 1) padded path: seg_num=7 exercises the repeat-pad (no concatenate pass).
    x_pad = jax.random.normal(k_x, (B, ts_d, 7, d_model), jnp.float32)
    out_pad = jax.block_until_ready(seg_merging_forward(x_pad, params, win_size=win_size))
    ref_pad = _reference_forward(x_pad, params, win_size=win_size)
    assert out_pad.shape == (B, ts_d, 4, d_model), out_pad.shape
    assert jnp.allclose(out_pad, ref_pad, atol=5e-3, rtol=5e-3), \
        float(jnp.max(jnp.abs(out_pad - ref_pad)))

    # 2) no-pad path: seg_num=8 uses the flat-slab kernel on the free reshape.
    x_np = jax.random.normal(k_x2, (B, ts_d, 8, d_model), jnp.float32)
    out_np = jax.block_until_ready(seg_merging_forward(x_np, params, win_size=win_size))
    ref_np = _reference_forward(x_np, params, win_size=win_size)
    assert out_np.shape == (B, ts_d, 4, d_model), out_np.shape
    assert jnp.allclose(out_np, ref_np, atol=5e-3, rtol=5e-3), \
        float(jnp.max(jnp.abs(out_np - ref_np)))

    # 3) bf16 path (MXU-native matmul) -- looser tolerance vs the f32 reference.
    x_bf = x_np.astype(jnp.bfloat16)
    params_bf = {k: v.astype(jnp.bfloat16) for k, v in params.items()}
    out_bf = jax.block_until_ready(seg_merging_forward(x_bf, params_bf, win_size=win_size))
    assert out_bf.shape == (B, ts_d, 4, d_model), out_bf.shape
    assert out_bf.dtype == jnp.bfloat16
    assert jnp.allclose(out_bf.astype(jnp.float32), ref_np, atol=5e-2, rtol=5e-2), \
        float(jnp.max(jnp.abs(out_bf.astype(jnp.float32) - ref_np)))

    print("KERNEL_OK")
</pallas_src>

<mosaic_0001>
module attributes {stable_mosaic.version = 11 : i64} {
  func.func @_pad_merge_kernel(%arg0: i32, %arg1: memref<8x896xf32, #tpu.memory_space<vmem>>, %arg2: memref<256x128xf32, #tpu.memory_space<vmem>>, %arg3: memref<1x128xf32, #tpu.memory_space<vmem>>, %arg4: memref<8x512xf32, #tpu.memory_space<vmem>>) attributes {dimension_semantics = [#tpu.dimension_semantics<parallel>], iteration_bounds = array<i64: 1>, scalar_prefetch = 0 : i64, scratch_operands = 0 : i64, tpu.core_type = #tpu.core_type<tc>, window_params = [{transform_indices = @transform_0, window_bounds = array<i64: 8, 896>}, {pipeline_mode = #tpu.pipeline_mode<synchronous>, transform_indices = @transform_1, window_bounds = array<i64: 256, 128>}, {pipeline_mode = #tpu.pipeline_mode<synchronous>, transform_indices = @transform_2, window_bounds = array<i64: 1, 128>}, {transform_indices = @transform_3, window_bounds = array<i64: 8, 512>}]} {
    %c0 = arith.constant 0 : index
    %c0_0 = arith.constant 0 : index
    %0 = vector.load %arg3[%c0, %c0_0] : memref<1x128xf32, #tpu.memory_space<vmem>>, vector<1x128xf32>
    %c0_1 = arith.constant 0 : index
    %c0_2 = arith.constant 0 : index
    %1 = vector.load %arg1[%c0_1, %c0_2] : memref<8x896xf32, #tpu.memory_space<vmem>>, vector<8x128xf32>
    %c0_3 = arith.constant 0 : index
    %c128 = arith.constant 128 : index
    %2 = vector.load %arg1[%c0_3, %c128] : memref<8x896xf32, #tpu.memory_space<vmem>>, vector<8x128xf32>
    %cst = arith.constant dense<0.000000e+00> : vector<8xf32>
    %3 = vector.multi_reduction <add>, %1, %cst [1] : vector<8x128xf32> to vector<8xf32>
    %4 = vector.shape_cast %3 : vector<8xf32> to vector<8x1xf32>
    %cst_4 = arith.constant dense<0.000000e+00> : vector<8xf32>
    %5 = vector.multi_reduction <add>, %2, %cst_4 [1] : vector<8x128xf32> to vector<8xf32>
    %6 = vector.shape_cast %5 : vector<8xf32> to vector<8x1xf32>
    %7 = arith.addf %4, %6 : vector<8x1xf32>
    %cst_5 = arith.constant 3.906250e-03 : f32
    %8 = vector.broadcast %cst_5 : f32 to vector<8x1xf32>
    %9 = arith.mulf %7, %8 : vector<8x1xf32>
    %10 = vector.broadcast %9 : vector<8x1xf32> to vector<8x128xf32>
    %11 = arith.subf %1, %10 : vector<8x128xf32>
    %12 = arith.mulf %11, %11 : vector<8x128xf32>
    %cst_6 = arith.constant dense<0.000000e+00> : vector<8xf32>
    %13 = vector.multi_reduction <add>, %12, %cst_6 [1] : vector<8x128xf32> to vector<8xf32>
    %14 = vector.shape_cast %13 : vector<8xf32> to vector<8x1xf32>
    %15 = vector.broadcast %9 : vector<8x1xf32> to vector<8x128xf32>
    %16 = arith.subf %2, %15 : vector<8x128xf32>
    %17 = arith.mulf %16, %16 : vector<8x128xf32>
    %cst_7 = arith.constant dense<0.000000e+00> : vector<8xf32>
    %18 = vector.multi_reduction <add>, %17, %cst_7 [1] : vector<8x128xf32> to vector<8xf32>
    %19 = vector.shape_cast %18 : vector<8xf32> to vector<8x1xf32>
    %20 = arith.addf %14, %19 : vector<8x1xf32>
    %cst_8 = arith.constant 3.906250e-03 : f32
    %21 = vector.broadcast %cst_8 : f32 to vector<8x1xf32>
    %22 = arith.mulf %20, %21 : vector<8x1xf32>
    %cst_9 = arith.constant 9.99999974E-6 : f32
    %23 = vector.broadcast %cst_9 : f32 to vector<8x1xf32>
    %24 = arith.addf %22, %23 : vector<8x1xf32>
    %25 = math.rsqrt %24 : vector<8x1xf32>
    %26 = vector.broadcast %9 : vector<8x1xf32> to vector<8x128xf32>
    %27 = arith.subf %1, %26 : vector<8x128xf32>
    %28 = vector.broadcast %25 : vector<8x1xf32> to vector<8x128xf32>
    %29 = arith.mulf %27, %28 : vector<8x128xf32>
    %c0_10 = arith.constant 0 : index
    %c0_11 = arith.constant 0 : index
    %30 = vector.load %arg2[%c0_10, %c0_11] : memref<256x128xf32, #tpu.memory_space<vmem>>, vector<128x128xf32>
    %cst_12 = arith.constant dense<0.000000e+00> : vector<8x128xf32>
    %31 = tpu.matmul %29, %30, %cst_12 {dimension_numbers = #tpu.dot_dimension_numbers<[1], [0], [0], [1], [0, 0, 1, 1], [], []>} : vector<8x128xf32>, vector<128x128xf32>, vector<8x128xf32> -> vector<8x128xf32>
    %32 = vector.broadcast %9 : vector<8x1xf32> to vector<8x128xf32>
    %33 = arith.subf %2, %32 : vector<8x128xf32>
    %34 = vector.broadcast %25 : vector<8x1xf32> to vector<8x128xf32>
    %35 = arith.mulf %33, %34 : vector<8x128xf32>
    %c128_13 = arith.constant 128 : index
    %c0_14 = arith.constant 0 : index
    %36 = vector.load %arg2[%c128_13, %c0_14] : memref<256x128xf32, #tpu.memory_space<vmem>>, vector<128x128xf32>
    %cst_15 = arith.constant dense<0.000000e+00> : vector<8x128xf32>
    %37 = tpu.matmul %35, %36, %cst_15 {dimension_numbers = #tpu.dot_dimension_numbers<[1], [0], [0], [1], [0, 0, 1, 1], [], []>} : vector<8x128xf32>, vector<128x128xf32>, vector<8x128xf32> -> vector<8x128xf32>
    %38 = arith.addf %31, %37 : vector<8x128xf32>
    %39 = vector.broadcast %0 : vector<1x128xf32> to vector<8x128xf32>
    %40 = arith.addf %38, %39 : vector<8x128xf32>
    %c0_16 = arith.constant 0 : index
    %c0_17 = arith.constant 0 : index
    %41 = vector.load %arg4[%c0_16, %c0_17] : memref<8x512xf32, #tpu.memory_space<vmem>>, vector<8x128xf32>
    tpu.vector_store %arg4[%c0_16, %c0_17], %40 {strides = array<i32>} : memref<8x512xf32, #tpu.memory_space<vmem>>, vector<8x128xf32>,
    %c0_18 = arith.constant 0 : index
    %c256 = arith.constant 256 : index
    %42 = vector.load %arg1[%c0_18, %c256] : memref<8x896xf32, #tpu.memory_space<vmem>>, vector<8x128xf32>
    %c0_19 = arith.constant 0 : index
    %c384 = arith.constant 384 : index
    %43 = vector.load %arg1[%c0_19, %c384] : memref<8x896xf32, #tpu.memory_space<vmem>>, vector<8x128xf32>
    %cst_20 = arith.constant dense<0.000000e+00> : vector<8xf32>
    %44 = vector.multi_reduction <add>, %42, %cst_20 [1] : vector<8x128xf32> to vector<8xf32>
    %45 = vector.shape_cast %44 : vector<8xf32> to vector<8x1xf32>
    %cst_21 = arith.constant dense<0.000000e+00> : vector<8xf32>
    %46 = vector.multi_reduction <add>, %43, %cst_21 [1] : vector<8x128xf32> to vector<8xf32>
    %47 = vector.shape_cast %46 : vector<8xf32> to vector<8x1xf32>
    %48 = arith.addf %45, %47 : vector<8x1xf32>
    %cst_22 = arith.constant 3.906250e-03 : f32
    %49 = vector.broadcast %cst_22 : f32 to vector<8x1xf32>
    %50 = arith.mulf %48, %49 : vector<8x1xf32>
    %51 = vector.broadcast %50 : vector<8x1xf32> to vector<8x128xf32>
    %52 = arith.subf %42, %51 : vector<8x128xf32>
    %53 = arith.mulf %52, %52 : vector<8x128xf32>
    %cst_23 = arith.constant dense<0.000000e+00> : vector<8xf32>
    %54 = vector.multi_reduction <add>, %53, %cst_23 [1] : vector<8x128xf32> to vector<8xf32>
    %55 = vector.shape_cast %54 : vector<8xf32> to vector<8x1xf32>
    %56 = vector.broadcast %50 : vector<8x1xf32> to vector<8x128xf32>
    %57 = arith.subf %43, %56 : vector<8x128xf32>
    %58 = arith.mulf %57, %57 : vector<8x128xf32>
    %cst_24 = arith.constant dense<0.000000e+00> : vector<8xf32>
    %59 = vector.multi_reduction <add>, %58, %cst_24 [1] : vector<8x128xf32> to vector<8xf32>
    %60 = vector.shape_cast %59 : vector<8xf32> to vector<8x1xf32>
    %61 = arith.addf %55, %60 : vector<8x1xf32>
    %cst_25 = arith.constant 3.906250e-03 : f32
    %62 = vector.broadcast %cst_25 : f32 to vector<8x1xf32>
    %63 = arith.mulf %61, %62 : vector<8x1xf32>
    %cst_26 = arith.constant 9.99999974E-6 : f32
    %64 = vector.broadcast %cst_26 : f32 to vector<8x1xf32>
    %65 = arith.addf %63, %64 : vector<8x1xf32>
    %66 = math.rsqrt %65 : vector<8x1xf32>
    %67 = vector.broadcast %50 : vector<8x1xf32> to vector<8x128xf32>
    %68 = arith.subf %42, %67 : vector<8x128xf32>
    %69 = vector.broadcast %66 : vector<8x1xf32> to vector<8x128xf32>
    %70 = arith.mulf %68, %69 : vector<8x128xf32>
    %c0_27 = arith.constant 0 : index
    %c0_28 = arith.constant 0 : index
    %71 = vector.load %arg2[%c0_27, %c0_28] : memref<256x128xf32, #tpu.memory_space<vmem>>, vector<128x128xf32>
    %cst_29 = arith.constant dense<0.000000e+00> : vector<8x128xf32>
    %72 = tpu.matmul %70, %71, %cst_29 {dimension_numbers = #tpu.dot_dimension_numbers<[1], [0], [0], [1], [0, 0, 1, 1], [], []>} : vector<8x128xf32>, vector<128x128xf32>, vector<8x128xf32> -> vector<8x128xf32>
    %73 = vector.broadcast %50 : vector<8x1xf32> to vector<8x128xf32>
    %74 = arith.subf %43, %73 : vector<8x128xf32>
    %75 = vector.broadcast %66 : vector<8x1xf32> to vector<8x128xf32>
    %76 = arith.mulf %74, %75 : vector<8x128xf32>
    %c128_30 = arith.constant 128 : index
    %c0_31 = arith.constant 0 : index
    %77 = vector.load %arg2[%c128_30, %c0_31] : memref<256x128xf32, #tpu.memory_space<vmem>>, vector<128x128xf32>
    %cst_32 = arith.constant dense<0.000000e+00> : vector<8x128xf32>
    %78 = tpu.matmul %76, %77, %cst_32 {dimension_numbers = #tpu.dot_dimension_numbers<[1], [0], [0], [1], [0, 0, 1, 1], [], []>} : vector<8x128xf32>, vector<128x128xf32>, vector<8x128xf32> -> vector<8x128xf32>
    %79 = arith.addf %72, %78 : vector<8x128xf32>
    %80 = vector.broadcast %0 : vector<1x128xf32> to vector<8x128xf32>
    %81 = arith.addf %79, %80 : vector<8x128xf32>
    %c0_33 = arith.constant 0 : index
    %c128_34 = arith.constant 128 : index
    %82 = vector.load %arg4[%c0_33, %c128_34] : memref<8x512xf32, #tpu.memory_space<vmem>>, vector<8x128xf32>
    tpu.vector_store %arg4[%c0_33, %c128_34], %81 {strides = array<i32>} : memref<8x512xf32, #tpu.memory_space<vmem>>, vector<8x128xf32>,
    %c0_35 = arith.constant 0 : index
    %c512 = arith.constant 512 : index
    %83 = vector.load %arg1[%c0_35, %c512] : memref<8x896xf32, #tpu.memory_space<vmem>>, vector<8x128xf32>
    %c0_36 = arith.constant 0 : index
    %c640 = arith.constant 640 : index
    %84 = vector.load %arg1[%c0_36, %c640] : memref<8x896xf32, #tpu.memory_space<vmem>>, vector<8x128xf32>
    %cst_37 = arith.constant dense<0.000000e+00> : vector<8xf32>
    %85 = vector.multi_reduction <add>, %83, %cst_37 [1] : vector<8x128xf32> to vector<8xf32>
    %86 = vector.shape_cast %85 : vector<8xf32> to vector<8x1xf32>
    %cst_38 = arith.constant dense<0.000000e+00> : vector<8xf32>
    %87 = vector.multi_reduction <add>, %84, %cst_38 [1] : vector<8x128xf32> to vector<8xf32>
    %88 = vector.shape_cast %87 : vector<8xf32> to vector<8x1xf32>
    %89 = arith.addf %86, %88 : vector<8x1xf32>
    %cst_39 = arith.constant 3.906250e-03 : f32
    %90 = vector.broadcast %cst_39 : f32 to vector<8x1xf32>
    %91 = arith.mulf %89, %90 : vector<8x1xf32>
    %92 = vector.broadcast %91 : vector<8x1xf32> to vector<8x128xf32>
    %93 = arith.subf %83, %92 : vector<8x128xf32>
    %94 = arith.mulf %93, %93 : vector<8x128xf32>
    %cst_40 = arith.constant dense<0.000000e+00> : vector<8xf32>
    %95 = vector.multi_reduction <add>, %94, %cst_40 [1] : vector<8x128xf32> to vector<8xf32>
    %96 = vector.shape_cast %95 : vector<8xf32> to vector<8x1xf32>
    %97 = vector.broadcast %91 : vector<8x1xf32> to vector<8x128xf32>
    %98 = arith.subf %84, %97 : vector<8x128xf32>
    %99 = arith.mulf %98, %98 : vector<8x128xf32>
    %cst_41 = arith.constant dense<0.000000e+00> : vector<8xf32>
    %100 = vector.multi_reduction <add>, %99, %cst_41 [1] : vector<8x128xf32> to vector<8xf32>
    %101 = vector.shape_cast %100 : vector<8xf32> to vector<8x1xf32>
    %102 = arith.addf %96, %101 : vector<8x1xf32>
    %cst_42 = arith.constant 3.906250e-03 : f32
    %103 = vector.broadcast %cst_42 : f32 to vector<8x1xf32>
    %104 = arith.mulf %102, %103 : vector<8x1xf32>
    %cst_43 = arith.constant 9.99999974E-6 : f32
    %105 = vector.broadcast %cst_43 : f32 to vector<8x1xf32>
    %106 = arith.addf %104, %105 : vector<8x1xf32>
    %107 = math.rsqrt %106 : vector<8x1xf32>
    %108 = vector.broadcast %91 : vector<8x1xf32> to vector<8x128xf32>
    %109 = arith.subf %83, %108 : vector<8x128xf32>
    %110 = vector.broadcast %107 : vector<8x1xf32> to vector<8x128xf32>
    %111 = arith.mulf %109, %110 : vector<8x128xf32>
    %c0_44 = arith.constant 0 : index
    %c0_45 = arith.constant 0 : index
    %112 = vector.load %arg2[%c0_44, %c0_45] : memref<256x128xf32, #tpu.memory_space<vmem>>, vector<128x128xf32>
    %cst_46 = arith.constant dense<0.000000e+00> : vector<8x128xf32>
    %113 = tpu.matmul %111, %112, %cst_46 {dimension_numbers = #tpu.dot_dimension_numbers<[1], [0], [0], [1], [0, 0, 1, 1], [], []>} : vector<8x128xf32>, vector<128x128xf32>, vector<8x128xf32> -> vector<8x128xf32>
    %114 = vector.broadcast %91 : vector<8x1xf32> to vector<8x128xf32>
    %115 = arith.subf %84, %114 : vector<8x128xf32>
    %116 = vector.broadcast %107 : vector<8x1xf32> to vector<8x128xf32>
    %117 = arith.mulf %115, %116 : vector<8x128xf32>
    %c128_47 = arith.constant 128 : index
    %c0_48 = arith.constant 0 : index
    %118 = vector.load %arg2[%c128_47, %c0_48] : memref<256x128xf32, #tpu.memory_space<vmem>>, vector<128x128xf32>
    %cst_49 = arith.constant dense<0.000000e+00> : vector<8x128xf32>
    %119 = tpu.matmul %117, %118, %cst_49 {dimension_numbers = #tpu.dot_dimension_numbers<[1], [0], [0], [1], [0, 0, 1, 1], [], []>} : vector<8x128xf32>, vector<128x128xf32>, vector<8x128xf32> -> vector<8x128xf32>
    %120 = arith.addf %113, %119 : vector<8x128xf32>
    %121 = vector.broadcast %0 : vector<1x128xf32> to vector<8x128xf32>
    %122 = arith.addf %120, %121 : vector<8x128xf32>
    %c0_50 = arith.constant 0 : index
    %c256_51 = arith.constant 256 : index
    %123 = vector.load %arg4[%c0_50, %c256_51] : memref<8x512xf32, #tpu.memory_space<vmem>>, vector<8x128xf32>
    tpu.vector_store %arg4[%c0_50, %c256_51], %122 {strides = array<i32>} : memref<8x512xf32, #tpu.memory_space<vmem>>, vector<8x128xf32>,
    %c0_52 = arith.constant 0 : index
    %c768 = arith.constant 768 : index
    %124 = vector.load %arg1[%c0_52, %c768] : memref<8x896xf32, #tpu.memory_space<vmem>>, vector<8x128xf32>
    %c0_53 = arith.constant 0 : index
    %c768_54 = arith.constant 768 : index
    %125 = vector.load %arg1[%c0_53, %c768_54] : memref<8x896xf32, #tpu.memory_space<vmem>>, vector<8x128xf32>
    %cst_55 = arith.constant dense<0.000000e+00> : vector<8xf32>
    %126 = vector.multi_reduction <add>, %124, %cst_55 [1] : vector<8x128xf32> to vector<8xf32>
    %127 = vector.shape_cast %126 : vector<8xf32> to vector<8x1xf32>
    %cst_56 = arith.constant dense<0.000000e+00> : vector<8xf32>
    %128 = vector.multi_reduction <add>, %125, %cst_56 [1] : vector<8x128xf32> to vector<8xf32>
    %129 = vector.shape_cast %128 : vector<8xf32> to vector<8x1xf32>
    %130 = arith.addf %127, %129 : vector<8x1xf32>
    %cst_57 = arith.constant 3.906250e-03 : f32
    %131 = vector.broadcast %cst_57 : f32 to vector<8x1xf32>
    %132 = arith.mulf %130, %131 : vector<8x1xf32>
    %133 = vector.broadcast %132 : vector<8x1xf32> to vector<8x128xf32>
    %134 = arith.subf %124, %133 : vector<8x128xf32>
    %135 = arith.mulf %134, %134 : vector<8x128xf32>
    %cst_58 = arith.constant dense<0.000000e+00> : vector<8xf32>
    %136 = vector.multi_reduction <add>, %135, %cst_58 [1] : vector<8x128xf32> to vector<8xf32>
    %137 = vector.shape_cast %136 : vector<8xf32> to vector<8x1xf32>
    %138 = vector.broadcast %132 : vector<8x1xf32> to vector<8x128xf32>
    %139 = arith.subf %125, %138 : vector<8x128xf32>
    %140 = arith.mulf %139, %139 : vector<8x128xf32>
    %cst_59 = arith.constant dense<0.000000e+00> : vector<8xf32>
    %141 = vector.multi_reduction <add>, %140, %cst_59 [1] : vector<8x128xf32> to vector<8xf32>
    %142 = vector.shape_cast %141 : vector<8xf32> to vector<8x1xf32>
    %143 = arith.addf %137, %142 : vector<8x1xf32>
    %cst_60 = arith.constant 3.906250e-03 : f32
    %144 = vector.broadcast %cst_60 : f32 to vector<8x1xf32>
    %145 = arith.mulf %143, %144 : vector<8x1xf32>
    %cst_61 = arith.constant 9.99999974E-6 : f32
    %146 = vector.broadcast %cst_61 : f32 to vector<8x1xf32>
    %147 = arith.addf %145, %146 : vector<8x1xf32>
    %148 = math.rsqrt %147 : vector<8x1xf32>
    %149 = vector.broadcast %132 : vector<8x1xf32> to vector<8x128xf32>
    %150 = arith.subf %124, %149 : vector<8x128xf32>
    %151 = vector.broadcast %148 : vector<8x1xf32> to vector<8x128xf32>
    %152 = arith.mulf %150, %151 : vector<8x128xf32>
    %c0_62 = arith.constant 0 : index
    %c0_63 = arith.constant 0 : index
    %153 = vector.load %arg2[%c0_62, %c0_63] : memref<256x128xf32, #tpu.memory_space<vmem>>, vector<128x128xf32>
    %cst_64 = arith.constant dense<0.000000e+00> : vector<8x128xf32>
    %154 = tpu.matmul %152, %153, %cst_64 {dimension_numbers = #tpu.dot_dimension_numbers<[1], [0], [0], [1], [0, 0, 1, 1], [], []>} : vector<8x128xf32>, vector<128x128xf32>, vector<8x128xf32> -> vector<8x128xf32>
    %155 = vector.broadcast %132 : vector<8x1xf32> to vector<8x128xf32>
    %156 = arith.subf %125, %155 : vector<8x128xf32>
    %157 = vector.broadcast %148 : vector<8x1xf32> to vector<8x128xf32>
    %158 = arith.mulf %156, %157 : vector<8x128xf32>
    %c128_65 = arith.constant 128 : index
    %c0_66 = arith.constant 0 : index
    %159 = vector.load %arg2[%c128_65, %c0_66] : memref<256x128xf32, #tpu.memory_space<vmem>>, vector<128x128xf32>
    %cst_67 = arith.constant dense<0.000000e+00> : vector<8x128xf32>
    %160 = tpu.matmul %158, %159, %cst_67 {dimension_numbers = #tpu.dot_dimension_numbers<[1], [0], [0], [1], [0, 0, 1, 1], [], []>} : vector<8x128xf32>, vector<128x128xf32>, vector<8x128xf32> -> vector<8x128xf32>
    %161 = arith.addf %154, %160 : vector<8x128xf32>
    %162 = vector.broadcast %0 : vector<1x128xf32> to vector<8x128xf32>
    %163 = arith.addf %161, %162 : vector<8x128xf32>
    %c0_68 = arith.constant 0 : index
    %c384_69 = arith.constant 384 : index
    %164 = vector.load %arg4[%c0_68, %c384_69] : memref<8x512xf32, #tpu.memory_space<vmem>>, vector<8x128xf32>
    tpu.vector_store %arg4[%c0_68, %c384_69], %163 {strides = array<i32>} : memref<8x512xf32, #tpu.memory_space<vmem>>, vector<8x128xf32>,
    return
  }
  func.func @transform_0(%arg0: i32) -> (i32, i32) {
    %c0_i32 = arith.constant 0 : i32
    %c0_i32_0 = arith.constant 0 : i32
    return %arg0, %c0_i32 : i32, i32
  }
  func.func @transform_1(%arg0: i32) -> (i32, i32) {
    %c0_i32 = arith.constant 0 : i32
    %c0_i32_0 = arith.constant 0 : i32
    %c0_i32_1 = arith.constant 0 : i32
    return %c0_i32, %c0_i32_0 : i32, i32
  }
  func.func @transform_2(%arg0: i32) -> (i32, i32) {
    %c0_i32 = arith.constant 0 : i32
    %c0_i32_0 = arith.constant 0 : i32
    %c0_i32_1 = arith.constant 0 : i32
    return %c0_i32, %c0_i32_0 : i32, i32
  }
  func.func @transform_3(%arg0: i32) -> (i32, i32) {
    %c0_i32 = arith.constant 0 : i32
    %c0_i32_0 = arith.constant 0 : i32
    return %arg0, %c0_i32 : i32, i32
  }
}

module attributes {stable_mosaic.version = 11 : i64} {
  func.func @_pad_merge_kernel(%arg0: i32, %arg1: memref<8x896xf32, #tpu.memory_space<vmem>>, %arg2: memref<256x128xf32, #tpu.memory_space<vmem>>, %arg3: memref<1x128xf32, #tpu.memory_space<vmem>>, %arg4: memref<8x512xf32, #tpu.memory_space<vmem>>) attributes {dimension_semantics = [#tpu.dimension_semantics<parallel>], iteration_bounds = array<i64: 1>, scalar_prefetch = 0 : i64, scratch_operands = 0 : i64, tpu.core_type = #tpu.core_type<tc>, window_params = [{transform_indices = @transform_0, window_bounds = array<i64: 8, 896>}, {pipeline_mode = #tpu.pipeline_mode<synchronous>, transform_indices = @transform_1, window_bounds = array<i64: 256, 128>}, {pipeline_mode = #tpu.pipeline_mode<synchronous>, transform_indices = @transform_2, window_bounds = array<i64: 1, 128>}, {transform_indices = @transform_3, window_bounds = array<i64: 8, 512>}]} {
    %c0 = arith.constant 0 : index
    %c0_0 = arith.constant 0 : index
    %0 = vector.load %arg3[%c0, %c0_0] : memref<1x128xf32, #tpu.memory_space<vmem>>, vector<1x128xf32>
    %c0_1 = arith.constant 0 : index
    %c0_2 = arith.constant 0 : index
    %1 = vector.load %arg1[%c0_1, %c0_2] : memref<8x896xf32, #tpu.memory_space<vmem>>, vector<8x128xf32>
    %c0_3 = arith.constant 0 : index
    %c128 = arith.constant 128 : index
    %2 = vector.load %arg1[%c0_3, %c128] : memref<8x896xf32, #tpu.memory_space<vmem>>, vector<8x128xf32>
    %cst = arith.constant dense<0.000000e+00> : vector<8xf32>
    %3 = vector.multi_reduction <add>, %1, %cst [1] : vector<8x128xf32> to vector<8xf32>
    %4 = vector.shape_cast %3 : vector<8xf32> to vector<8x1xf32>
    %cst_4 = arith.constant dense<0.000000e+00> : vector<8xf32>
    %5 = vector.multi_reduction <add>, %2, %cst_4 [1] : vector<8x128xf32> to vector<8xf32>
    %6 = vector.shape_cast %5 : vector<8xf32> to vector<8x1xf32>
    %7 = arith.addf %4, %6 : vector<8x1xf32>
    %cst_5 = arith.constant 3.906250e-03 : f32
    %8 = vector.broadcast %cst_5 : f32 to vector<8x1xf32>
    %9 = arith.mulf %7, %8 : vector<8x1xf32>
    %10 = vector.broadcast %9 : vector<8x1xf32> to vector<8x128xf32>
    %11 = arith.subf %1, %10 : vector<8x128xf32>
    %12 = arith.mulf %11, %11 : vector<8x128xf32>
    %cst_6 = arith.constant dense<0.000000e+00> : vector<8xf32>
    %13 = vector.multi_reduction <add>, %12, %cst_6 [1] : vector<8x128xf32> to vector<8xf32>
    %14 = vector.shape_cast %13 : vector<8xf32> to vector<8x1xf32>
    %15 = vector.broadcast %9 : vector<8x1xf32> to vector<8x128xf32>
    %16 = arith.subf %2, %15 : vector<8x128xf32>
    %17 = arith.mulf %16, %16 : vector<8x128xf32>
    %cst_7 = arith.constant dense<0.000000e+00> : vector<8xf32>
    %18 = vector.multi_reduction <add>, %17, %cst_7 [1] : vector<8x128xf32> to vector<8xf32>
    %19 = vector.shape_cast %18 : vector<8xf32> to vector<8x1xf32>
    %20 = arith.addf %14, %19 : vector<8x1xf32>
    %cst_8 = arith.constant 3.906250e-03 : f32
    %21 = vector.broadcast %cst_8 : f32 to vector<8x1xf32>
    %22 = arith.mulf %20, %21 : vector<8x1xf32>
    %cst_9 = arith.constant 9.99999974E-6 : f32
    %23 = vector.broadcast %cst_9 : f32 to vector<8x1xf32>
    %24 = arith.addf %22, %23 : vector<8x1xf32>
    %25 = math.rsqrt %24 : vector<8x1xf32>
    %26 = vector.broadcast %9 : vector<8x1xf32> to vector<8x128xf32>
    %27 = arith.subf %1, %26 : vector<8x128xf32>
    %28 = vector.broadcast %25 : vector<8x1xf32> to vector<8x128xf32>
    %29 = arith.mulf %27, %28 : vector<8x128xf32>
    %c0_10 = arith.constant 0 : index
    %c0_11 = arith.constant 0 : index
    %30 = vector.load %arg2[%c0_10, %c0_11] : memref<256x128xf32, #tpu.memory_space<vmem>>, vector<128x128xf32>
    %cst_12 = arith.constant dense<0.000000e+00> : vector<8x128xf32>
    %31 = tpu.matmul %29, %30, %cst_12 {dimension_numbers = #tpu.dot_dimension_numbers<[1], [0], [0], [1], [0, 0, 1, 1], [], []>} : vector<8x128xf32>, vector<128x128xf32>, vector<8x128xf32> -> vector<8x128xf32>
    %32 = vector.broadcast %9 : vector<8x1xf32> to vector<8x128xf32>
    %33 = arith.subf %2, %32 : vector<8x128xf32>
    %34 = vector.broadcast %25 : vector<8x1xf32> to vector<8x128xf32>
    %35 = arith.mulf %33, %34 : vector<8x128xf32>
    %c128_13 = arith.constant 128 : index
    %c0_14 = arith.constant 0 : index
    %36 = vector.load %arg2[%c128_13, %c0_14] : memref<256x128xf32, #tpu.memory_space<vmem>>, vector<128x128xf32>
    %cst_15 = arith.constant dense<0.000000e+00> : vector<8x128xf32>
    %37 = tpu.matmul %35, %36, %cst_15 {dimension_numbers = #tpu.dot_dimension_numbers<[1], [0], [0], [1], [0, 0, 1, 1], [], []>} : vector<8x128xf32>, vector<128x128xf32>, vector<8x128xf32> -> vector<8x128xf32>
    %38 = arith.addf %31, %37 : vector<8x128xf32>
    %39 = vector.broadcast %0 : vector<1x128xf32> to vector<8x128xf32>
    %40 = arith.addf %38, %39 : vector<8x128xf32>
    %c0_16 = arith.constant 0 : index
    %c0_17 = arith.constant 0 : index
    %41 = vector.load %arg4[%c0_16, %c0_17] : memref<8x512xf32, #tpu.memory_space<vmem>>, vector<8x128xf32>
    tpu.vector_store %arg4[%c0_16, %c0_17], %40 {strides = array<i32>} : memref<8x512xf32, #tpu.memory_space<vmem>>, vector<8x128xf32>,
    %c0_18 = arith.constant 0 : index
    %c256 = arith.constant 256 : index
    %42 = vector.load %arg1[%c0_18, %c256] : memref<8x896xf32, #tpu.memory_space<vmem>>, vector<8x128xf32>
    %c0_19 = arith.constant 0 : index
    %c384 = arith.constant 384 : index
    %43 = vector.load %arg1[%c0_19, %c384] : memref<8x896xf32, #tpu.memory_space<vmem>>, vector<8x128xf32>
    %cst_20 = arith.constant dense<0.000000e+00> : vector<8xf32>
    %44 = vector.multi_reduction <add>, %42, %cst_20 [1] : vector<8x128xf32> to vector<8xf32>
    %45 = vector.shape_cast %44 : vector<8xf32> to vector<8x1xf32>
    %cst_21 = arith.constant dense<0.000000e+00> : vector<8xf32>
    %46 = vector.multi_reduction <add>, %43, %cst_21 [1] : vector<8x128xf32> to vector<8xf32>
    %47 = vector.shape_cast %46 : vector<8xf32> to vector<8x1xf32>
    %48 = arith.addf %45, %47 : vector<8x1xf32>
    %cst_22 = arith.constant 3.906250e-03 : f32
    %49 = vector.broadcast %cst_22 : f32 to vector<8x1xf32>
    %50 = arith.mulf %48, %49 : vector<8x1xf32>
    %51 = vector.broadcast %50 : vector<8x1xf32> to vector<8x128xf32>
    %52 = arith.subf %42, %51 : vector<8x128xf32>
    %53 = arith.mulf %52, %52 : vector<8x128xf32>
    %cst_23 = arith.constant dense<0.000000e+00> : vector<8xf32>
    %54 = vector.multi_reduction <add>, %53, %cst_23 [1] : vector<8x128xf32> to vector<8xf32>
    %55 = vector.shape_cast %54 : vector<8xf32> to vector<8x1xf32>
    %56 = vector.broadcast %50 : vector<8x1xf32> to vector<8x128xf32>
    %57 = arith.subf %43, %56 : vector<8x128xf32>
    %58 = arith.mulf %57, %57 : vector<8x128xf32>
    %cst_24 = arith.constant dense<0.000000e+00> : vector<8xf32>
    %59 = vector.multi_reduction <add>, %58, %cst_24 [1] : vector<8x128xf32> to vector<8xf32>
    %60 = vector.shape_cast %59 : vector<8xf32> to vector<8x1xf32>
    %61 = arith.addf %55, %60 : vector<8x1xf32>
    %cst_25 = arith.constant 3.906250e-03 : f32
    %62 = vector.broadcast %cst_25 : f32 to vector<8x1xf32>
    %63 = arith.mulf %61, %62 : vector<8x1xf32>
    %cst_26 = arith.constant 9.99999974E-6 : f32
    %64 = vector.broadcast %cst_26 : f32 to vector<8x1xf32>
    %65 = arith.addf %63, %64 : vector<8x1xf32>
    %66 = math.rsqrt %65 : vector<8x1xf32>
    %67 = vector.broadcast %50 : vector<8x1xf32> to vector<8x128xf32>
    %68 = arith.subf %42, %67 : vector<8x128xf32>
    %69 = vector.broadcast %66 : vector<8x1xf32> to vector<8x128xf32>
    %70 = arith.mulf %68, %69 : vector<8x128xf32>
    %c0_27 = arith.constant 0 : index
    %c0_28 = arith.constant 0 : index
    %71 = vector.load %arg2[%c0_27, %c0_28] : memref<256x128xf32, #tpu.memory_space<vmem>>, vector<128x128xf32>
    %cst_29 = arith.constant dense<0.000000e+00> : vector<8x128xf32>
    %72 = tpu.matmul %70, %71, %cst_29 {dimension_numbers = #tpu.dot_dimension_numbers<[1], [0], [0], [1], [0, 0, 1, 1], [], []>} : vector<8x128xf32>, vector<128x128xf32>, vector<8x128xf32> -> vector<8x128xf32>
    %73 = vector.broadcast %50 : vector<8x1xf32> to vector<8x128xf32>
    %74 = arith.subf %43, %73 : vector<8x128xf32>
    %75 = vector.broadcast %66 : vector<8x1xf32> to vector<8x128xf32>
    %76 = arith.mulf %74, %75 : vector<8x128xf32>
    %c128_30 = arith.constant 128 : index
    %c0_31 = arith.constant 0 : index
    %77 = vector.load %arg2[%c128_30, %c0_31] : memref<256x128xf32, #tpu.memory_space<vmem>>, vector<128x128xf32>
    %cst_32 = arith.constant dense<0.000000e+00> : vector<8x128xf32>
    %78 = tpu.matmul %76, %77, %cst_32 {dimension_numbers = #tpu.dot_dimension_numbers<[1], [0], [0], [1], [0, 0, 1, 1], [], []>} : vector<8x128xf32>, vector<128x128xf32>, vector<8x128xf32> -> vector<8x128xf32>
    %79 = arith.addf %72, %78 : vector<8x128xf32>
    %80 = vector.broadcast %0 : vector<1x128xf32> to vector<8x128xf32>
    %81 = arith.addf %79, %80 : vector<8x128xf32>
    %c0_33 = arith.constant 0 : index
    %c128_34 = arith.constant 128 : index
    %82 = vector.load %arg4[%c0_33, %c128_34] : memref<8x512xf32, #tpu.memory_space<vmem>>, vector<8x128xf32>
    tpu.vector_store %arg4[%c0_33, %c128_34], %81 {strides = array<i32>} : memref<8x512xf32, #tpu.memory_space<vmem>>, vector<8x128xf32>,
    %c0_35 = arith.constant 0 : index
    %c512 = arith.constant 512 : index
    %83 = vector.load %arg1[%c0_35, %c512] : memref<8x896xf32, #tpu.memory_space<vmem>>, vector<8x128xf32>
    %c0_36 = arith.constant 0 : index
    %c640 = arith.constant 640 : index
    %84 = vector.load %arg1[%c0_36, %c640] : memref<8x896xf32, #tpu.memory_space<vmem>>, vector<8x128xf32>
    %cst_37 = arith.constant dense<0.000000e+00> : vector<8xf32>
    %85 = vector.multi_reduction <add>, %83, %cst_37 [1] : vector<8x128xf32> to vector<8xf32>
    %86 = vector.shape_cast %85 : vector<8xf32> to vector<8x1xf32>
    %cst_38 = arith.constant dense<0.000000e+00> : vector<8xf32>
    %87 = vector.multi_reduction <add>, %84, %cst_38 [1] : vector<8x128xf32> to vector<8xf32>
    %88 = vector.shape_cast %87 : vector<8xf32> to vector<8x1xf32>
    %89 = arith.addf %86, %88 : vector<8x1xf32>
    %cst_39 = arith.constant 3.906250e-03 : f32
    %90 = vector.broadcast %cst_39 : f32 to vector<8x1xf32>
    %91 = arith.mulf %89, %90 : vector<8x1xf32>
    %92 = vector.broadcast %91 : vector<8x1xf32> to vector<8x128xf32>
    %93 = arith.subf %83, %92 : vector<8x128xf32>
    %94 = arith.mulf %93, %93 : vector<8x128xf32>
    %cst_40 = arith.constant dense<0.000000e+00> : vector<8xf32>
    %95 = vector.multi_reduction <add>, %94, %cst_40 [1] : vector<8x128xf32> to vector<8xf32>
    %96 = vector.shape_cast %95 : vector<8xf32> to vector<8x1xf32>
    %97 = vector.broadcast %91 : vector<8x1xf32> to vector<8x128xf32>
    %98 = arith.subf %84, %97 : vector<8x128xf32>
    %99 = arith.mulf %98, %98 : vector<8x128xf32>
    %cst_41 = arith.constant dense<0.000000e+00> : vector<8xf32>
    %100 = vector.multi_reduction <add>, %99, %cst_41 [1] : vector<8x128xf32> to vector<8xf32>
    %101 = vector.shape_cast %100 : vector<8xf32> to vector<8x1xf32>
    %102 = arith.addf %96, %101 : vector<8x1xf32>
    %cst_42 = arith.constant 3.906250e-03 : f32
    %103 = vector.broadcast %cst_42 : f32 to vector<8x1xf32>
    %104 = arith.mulf %102, %103 : vector<8x1xf32>
    %cst_43 = arith.constant 9.99999974E-6 : f32
    %105 = vector.broadcast %cst_43 : f32 to vector<8x1xf32>
    %106 = arith.addf %104, %105 : vector<8x1xf32>
    %107 = math.rsqrt %106 : vector<8x1xf32>
    %108 = vector.broadcast %91 : vector<8x1xf32> to vector<8x128xf32>
    %109 = arith.subf %83, %108 : vector<8x128xf32>
    %110 = vector.broadcast %107 : vector<8x1xf32> to vector<8x128xf32>
    %111 = arith.mulf %109, %110 : vector<8x128xf32>
    %c0_44 = arith.constant 0 : index
    %c0_45 = arith.constant 0 : index
    %112 = vector.load %arg2[%c0_44, %c0_45] : memref<256x128xf32, #tpu.memory_space<vmem>>, vector<128x128xf32>
    %cst_46 = arith.constant dense<0.000000e+00> : vector<8x128xf32>
    %113 = tpu.matmul %111, %112, %cst_46 {dimension_numbers = #tpu.dot_dimension_numbers<[1], [0], [0], [1], [0, 0, 1, 1], [], []>} : vector<8x128xf32>, vector<128x128xf32>, vector<8x128xf32> -> vector<8x128xf32>
    %114 = vector.broadcast %91 : vector<8x1xf32> to vector<8x128xf32>
    %115 = arith.subf %84, %114 : vector<8x128xf32>
    %116 = vector.broadcast %107 : vector<8x1xf32> to vector<8x128xf32>
    %117 = arith.mulf %115, %116 : vector<8x128xf32>
    %c128_47 = arith.constant 128 : index
    %c0_48 = arith.constant 0 : index
    %118 = vector.load %arg2[%c128_47, %c0_48] : memref<256x128xf32, #tpu.memory_space<vmem>>, vector<128x128xf32>
    %cst_49 = arith.constant dense<0.000000e+00> : vector<8x128xf32>
    %119 = tpu.matmul %117, %118, %cst_49 {dimension_numbers = #tpu.dot_dimension_numbers<[1], [0], [0], [1], [0, 0, 1, 1], [], []>} : vector<8x128xf32>, vector<128x128xf32>, vector<8x128xf32> -> vector<8x128xf32>
    %120 = arith.addf %113, %119 : vector<8x128xf32>
    %121 = vector.broadcast %0 : vector<1x128xf32> to vector<8x128xf32>
    %122 = arith.addf %120, %121 : vector<8x128xf32>
    %c0_50 = arith.constant 0 : index
    %c256_51 = arith.constant 256 : index
    %123 = vector.load %arg4[%c0_50, %c256_51] : memref<8x512xf32, #tpu.memory_space<vmem>>, vector<8x128xf32>
    tpu.vector_store %arg4[%c0_50, %c256_51], %122 {strides = array<i32>} : memref<8x512xf32, #tpu.memory_space<vmem>>, vector<8x128xf32>,
    %c0_52 = arith.constant 0 : index
    %c768 = arith.constant 768 : index
    %124 = vector.load %arg1[%c0_52, %c768] : memref<8x896xf32, #tpu.memory_space<vmem>>, vector<8x128xf32>
    %c0_53 = arith.constant 0 : index
    %c768_54 = arith.constant 768 : index
    %125 = vector.load %arg1[%c0_53, %c768_54] : memref<8x896xf32, #tpu.memory_space<vmem>>, vector<8x128xf32>
    %cst_55 = arith.constant dense<0.000000e+00> : vector<8xf32>
    %126 = vector.multi_reduction <add>, %124, %cst_55 [1] : vector<8x128xf32> to vector<8xf32>
    %127 = vector.shape_cast %126 : vector<8xf32> to vector<8x1xf32>
    %cst_56 = arith.constant dense<0.000000e+00> : vector<8xf32>
    %128 = vector.multi_reduction <add>, %125, %cst_56 [1] : vector<8x128xf32> to vector<8xf32>
    %129 = vector.shape_cast %128 : vector<8xf32> to vector<8x1xf32>
    %130 = arith.addf %127, %129 : vector<8x1xf32>
    %cst_57 = arith.constant 3.906250e-03 : f32
    %131 = vector.broadcast %cst_57 : f32 to vector<8x1xf32>
    %132 = arith.mulf %130, %131 : vector<8x1xf32>
    %133 = vector.broadcast %132 : vector<8x1xf32> to vector<8x128xf32>
    %134 = arith.subf %124, %133 : vector<8x128xf32>
    %135 = arith.mulf %134, %134 : vector<8x128xf32>
    %cst_58 = arith.constant dense<0.000000e+00> : vector<8xf32>
    %136 = vector.multi_reduction <add>, %135, %cst_58 [1] : vector<8x128xf32> to vector<8xf32>
    %137 = vector.shape_cast %136 : vector<8xf32> to vector<8x1xf32>
    %138 = vector.broadcast %132 : vector<8x1xf32> to vector<8x128xf32>
    %139 = arith.subf %125, %138 : vector<8x128xf32>
    %140 = arith.mulf %139, %139 : vector<8x128xf32>
    %cst_59 = arith.constant dense<0.000000e+00> : vector<8xf32>
    %141 = vector.multi_reduction <add>, %140, %cst_59 [1] : vector<8x128xf32> to vector<8xf32>
    %142 = vector.shape_cast %141 : vector<8xf32> to vector<8x1xf32>
    %143 = arith.addf %137, %142 : vector<8x1xf32>
    %cst_60 = arith.constant 3.906250e-03 : f32
    %144 = vector.broadcast %cst_60 : f32 to vector<8x1xf32>
    %145 = arith.mulf %143, %144 : vector<8x1xf32>
    %cst_61 = arith.constant 9.99999974E-6 : f32
    %146 = vector.broadcast %cst_61 : f32 to vector<8x1xf32>
    %147 = arith.addf %145, %146 : vector<8x1xf32>
    %148 = math.rsqrt %147 : vector<8x1xf32>
    %149 = vector.broadcast %132 : vector<8x1xf32> to vector<8x128xf32>
    %150 = arith.subf %124, %149 : vector<8x128xf32>
    %151 = vector.broadcast %148 : vector<8x1xf32> to vector<8x128xf32>
    %152 = arith.mulf %150, %151 : vector<8x128xf32>
    %c0_62 = arith.constant 0 : index
    %c0_63 = arith.constant 0 : index
    %153 = vector.load %arg2[%c0_62, %c0_63] : memref<256x128xf32, #tpu.memory_space<vmem>>, vector<128x128xf32>
    %cst_64 = arith.constant dense<0.000000e+00> : vector<8x128xf32>
    %154 = tpu.matmul %152, %153, %cst_64 {dimension_numbers = #tpu.dot_dimension_numbers<[1], [0], [0], [1], [0, 0, 1, 1], [], []>} : vector<8x128xf32>, vector<128x128xf32>, vector<8x128xf32> -> vector<8x128xf32>
    %155 = vector.broadcast %132 : vector<8x1xf32> to vector<8x128xf32>
    %156 = arith.subf %125, %155 : vector<8x128xf32>
    %157 = vector.broadcast %148 : vector<8x1xf32> to vector<8x128xf32>
    %158 = arith.mulf %156, %157 : vector<8x128xf32>
    %c128_65 = arith.constant 128 : index
    %c0_66 = arith.constant 0 : index
    %159 = vector.load %arg2[%c128_65, %c0_66] : memref<256x128xf32, #tpu.memory_space<vmem>>, vector<128x128xf32>
    %cst_67 = arith.constant dense<0.000000e+00> : vector<8x128xf32>
    %160 = tpu.matmul %158, %159, %cst_67 {dimension_numbers = #tpu.dot_dimension_numbers<[1], [0], [0], [1], [0, 0, 1, 1], [], []>} : vector<8x128xf32>, vector<128x128xf32>, vector<8x128xf32> -> vector<8x128xf32>
    %161 = arith.addf %154, %160 : vector<8x128xf32>
    %162 = vector.broadcast %0 : vector<1x128xf32> to vector<8x128xf32>
    %163 = arith.addf %161, %162 : vector<8x128xf32>
    %c0_68 = arith.constant 0 : index
    %c384_69 = arith.constant 384 : index
    %164 = vector.load %arg4[%c0_68, %c384_69] : memref<8x512xf32, #tpu.memory_space<vmem>>, vector<8x128xf32>
    tpu.vector_store %arg4[%c0_68, %c384_69], %163 {strides = array<i32>} : memref<8x512xf32, #tpu.memory_space<vmem>>, vector<8x128xf32>,
    return
  }
  func.func @transform_0(%arg0: i32) -> (i32, i32) {
    %c0_i32 = arith.constant 0 : i32
    %c0_i32_0 = arith.constant 0 : i32
    return %arg0, %c0_i32 : i32, i32
  }
  func.func @transform_1(%arg0: i32) -> (i32, i32) {
    %c0_i32 = arith.constant 0 : i32
    %c0_i32_0 = arith.constant 0 : i32
    %c0_i32_1 = arith.constant 0 : i32
    return %c0_i32, %c0_i32_0 : i32, i32
  }
  func.func @transform_2(%arg0: i32) -> (i32, i32) {
    %c0_i32 = arith.constant 0 : i32
    %c0_i32_0 = arith.constant 0 : i32
    %c0_i32_1 = arith.constant 0 : i32
    return %c0_i32, %c0_i32_0 : i32, i32
  }
  func.func @transform_3(%arg0: i32) -> (i32, i32) {
    %c0_i32 = arith.constant 0 : i32
    %c0_i32_0 = arith.constant 0 : i32
    return %arg0, %c0_i32 : i32, i32
  }
}

</mosaic_0001>

<bundles_post_ra>
// kernel: tpu_custom_call.1
= control target key start
LH: loop header
LB: loop body
LE: loop exit
PB: predicated region body
PF: predicated region fallthrough
CT: control target
= control target key end

     0   :  { %8 = vsyncpa [#allocation3], 0  ;;  %s1846_s0 = inlined_call_operand.hbm [shape: f32[8,896], index: 0, kind: input, shape index: {}]   ;;  %s1847_s1 = inlined_call_operand.hbm [shape: f32[256,128], index: 1, kind: input, shape index: {}]   ;;  %s1848_s2 = inlined_call_operand.vmem [shape: f32[1,128], index: 2, kind: input, shape index: {}]   ;;  %s1849_s3 = inlined_call_operand.hbm [shape: f32[8,512], index: 3, kind: output, shape index: {}]  }
   0x1   :  { %9 = vsyncpa [#allocation6], 0 }
   0x2   :  { %10 = vsyncpa [#allocation4], 0  ;;  %s1537_s12 = smov [#allocation2]   ;;  %s1538_s14 = smov [#allocation5]  }
   0x3   :  { %s17_s13 = sshll.u32 %s1537_s12, 4  ;;  %s26_s15 = sshll.u32 %s1538_s14, 4  ;;  %s18_s13 = int_to_ptr.vmem [resolvable:$true] %s17_s13  ;;  %s1565_s15 = int_to_ptr.vmem [resolvable:$true] %s26_s15 }
   0x4   :  { %s1465_s18 = scalar_lea.hbm %s1846_s0, 896 }
   0x5   :  { %p1466_p0 = scmp.ne.s32.totalorder %s1846_s0, %s1465_s18  ;;  %p1469_p1 = scmp.lt.u32.totalorder %s1465_s18, %s1846_s0 }
   0x7   :  { %p1471_p2 = pnand %p1469_p1, %p1466_p0 }
   0x9   :  { %1474 = shalt.err (!%p1471_p2)
}
   0xa   :  { %s1475_s23 = scalar_lea.vmem %s18_s13, 896  ;;  %p1480_p4 = scmp.lt.s32.totalorder %s18_s13, %s18_s13 }
   0xb   :  { %p1476_p3 = scmp.ne.s32.totalorder %s18_s13, %s1475_s23  ;;  %p1481_p5 = scmp.lt.s32.totalorder %s1475_s23, %s1475_s23 }
   0xd   :  { %p1482_p6 = por %p1481_p5, %p1480_p4 }
   0xf   :  { %p1483_p7 = pnand %p1482_p6, %p1476_p3 }
  0x11   :  { %1486 = shalt.err (!%p1483_p7)
}
  0x12   :  { %20 = dma.hbm_to_vmem [thread:$0]  %s1846_s0, 896, %s18_s13, [#allocation3]  }
  0x13   :  { %s1487_s28 = scalar_lea.hbm %s1847_s1, 4096 }
  0x14   :  { %p1488_p8 = scmp.ne.s32.totalorder %s1847_s1, %s1487_s28  ;;  %p1491_p9 = scmp.lt.u32.totalorder %s1487_s28, %s1847_s1 }
  0x16   :  { %p1493_p10 = pnand %p1491_p9, %p1488_p8 }
  0x18   :  { %1496 = shalt.err (!%p1493_p10)
}
  0x19   :  { %s1497_s6 = scalar_lea.vmem %s1565_s15, 4096  ;;  %p1502_p12 = scmp.lt.s32.totalorder %s1565_s15, %s1565_s15 }
  0x1a   :  { %p1498_p11 = scmp.ne.s32.totalorder %s1565_s15, %s1497_s6  ;;  %p1503_p13 = scmp.lt.s32.totalorder %s1497_s6, %s1497_s6 }
  0x1c   :  { %p1504_p0 = por %p1503_p13, %p1502_p12 }
  0x1e   :  { %p1505_p1 = pnand %p1504_p0, %p1498_p11 }
  0x20   :  { %1508 = shalt.err (!%p1505_p1)
}
  0x21   :  { %s1539_s0 = smov 128   ;;  %s1540_s7 = smov 8  }
  0x22   :  { %32 = dma.hbm_to_vmem [thread:$0]  %s1847_s1, 4096, %s1565_s15, [#allocation6], %s1539_s0, %s1539_s0, %s1540_s7  }
  0x23   :  { %1531 = dma.done.wait [#allocation3], 896  }
  0x24   :  { %1532 = vsyncadd [#allocation3], 4294966400 }
  0x25   :  { %1533 = dma.done.wait [#allocation6], 4096  }
  0x26   :  { %1534 = vsyncadd [#allocation6], 4294963200  ;;  %v1596_v0 = vld [vmem:[#allocation2] sm:$0xff]  ;;  %v1598_v1 = vld [vmem:[#allocation2 + $0x10] sm:$0xff]  ;;  %v1541_v9 = vmov 0.0|0.0   ;;  %vm1542_vm0 = vmmov 0  }
  0x27   :  { %44 = vadd.xlane.f32.xlu0 %v1596_v0  ;;  %246 = vadd.xlane.f32.xlu1 %v1598_v1  ;;  %v43_v2 = vld [vmem:[#allocation2 + $0x8] sm:$0xff]  ;;  %v1602_v3 = vld [vmem:[#allocation2 + $0x18] sm:$0xff]  ;;  %v1607_v5 = vld [vmem:[#allocation2 + $0x20] sm:$0xff] }
  0x28   :  { %v1605_v4 = vld [vmem:[#allocation2 + $0x28] sm:$0xff]  ;;  %v80_v6 = vld [vmem:[#allocation5 + $0x80] sm:$0xff]  ;;  %v81_v7 = vld [vmem:[#allocation5 + $0x88] sm:$0xff]  ;;  %1257 = vmatprep.subr.bf16.mxu0 %v1541_v9  ;;  %1281 = vmatprep.subr.bf16.mxu1 %v1541_v9 }
  0x29   :  { %v63_v8 = vld [vmem:[#allocation5] sm:$0xff]  ;;  %v1613_v10 = vpack.c.bf16 %v81_v7, %v80_v6  ;;  %v64_v11 = vld [vmem:[#allocation5 + $0x8] sm:$0xff]  ;;  %v82_v12 = vld [vmem:[#allocation5 + $0x90] sm:$0xff] }
  0x2a   :  { %v83_v13 = vld [vmem:[#allocation5 + $0x98] sm:$0xff]  ;;  %v1615_v14 = vpack.c.bf16 %v64_v11, %v63_v8  ;;  %v65_v15 = vld [vmem:[#allocation5 + $0x10] sm:$0xff]  ;;  %v84_v19 = vld [vmem:[#allocation5 + $0xa0] sm:$0xff] }
  0x2b   :  { %46 = vadd.xlane.f32.xlu0 %v43_v2  ;;  %248 = vadd.xlane.f32.xlu1 %v1602_v3  ;;  %v66_v16 = vld [vmem:[#allocation5 + $0x18] sm:$0xff]  ;;  %v1618_v17 = vpack.c.bf16 %v83_v13, %v82_v12  ;;  %v85_v20 = vld [vmem:[#allocation5 + $0xa8] sm:$0xff]  ;;  %v67_v21 = vld [vmem:[#allocation5 + $0x20] sm:$0xff] }
  0x2c   :  { %1259 = vmatpush3.bf16.msra.mxu0 %v1613_v10  ;;  %1283 = vmatpush3.bf16.msra.mxu1 %v1615_v14  ;;  %v1622_v18 = vpack.c.bf16 %v66_v16, %v65_v15  ;;  %v68_v22 = vld [vmem:[#allocation5 + $0x28] sm:$0xff]  ;;  %v1626_v23 = vpack.c.bf16 %v85_v20, %v84_v19  ;;  %v86_v25 = vld [vmem:[#allocation5 + $0xb0] sm:$0xff]  ;;  %v87_v26 = vld [vmem:[#allocation5 + $0xb8] sm:$0xff] }
  0x2d   :  { %1260 = vmatprep.subr.bf16.mxu0 %v1541_v9  ;;  %1284 = vmatprep.subr.bf16.mxu1 %v1541_v9  ;;  %v1630_v24 = vpack.c.bf16 %v68_v22, %v67_v21  ;;  %v69_v27 = vld [vmem:[#allocation5 + $0x30] sm:$0xff]  ;;  %v70_v28 = vld [vmem:[#allocation5 + $0x38] sm:$0xff]  ;;  %v1634_v29 = vpack.c.bf16 %v87_v26, %v86_v25  ;;  %v88_v56 = vld [vmem:[#allocation5 + $0xc0] sm:$0xff]  ;;  %v1543_v21 = vmov 0.0  }
  0x2e   :  { %v1638_v30 = vpack.c.bf16 %v70_v28, %v69_v27  ;;  %v1665_v51 = vld [vmem:[#allocation2 + $0x30] sm:$0xff]  ;;  %v89_v57 = vld [vmem:[#allocation5 + $0xc8] sm:$0xff]  ;;  %v71_v58 = vld [vmem:[#allocation5 + $0x40] sm:$0xff]  ;;  %1009 = vmatprep.mubr.msk.f32.mxu0 %vm1542_vm0, %v1543_v21  ;;  %1044 = vmatprep.mubr.msk.f32.mxu1 %vm1542_vm0, %v1543_v21 }
  0x2f   :  { %444 = vadd.xlane.f32.xlu1 %v1605_v4  ;;  %442 = vadd.xlane.f32.xlu0 %v1607_v5  ;;  %v1677_v59 = vpack.c.bf16 %v89_v57, %v88_v56  ;;  %v72_v60 = vld [vmem:[#allocation5 + $0x48] sm:$0xff]  ;;  %v90_v62 = vld [vmem:[#allocation5 + $0xd0] sm:$0xff]  ;;  %v91_v63 = vld [vmem:[#allocation5 + $0xd8] sm:$0xff] }
  0x30   :  { %1262 = vmatpush3.bf16.msra.mxu0 %v1618_v17  ;;  %1286 = vmatpush3.bf16.msra.mxu1 %v1622_v18  ;;  %v1679_v61 = vpack.c.bf16 %v72_v60, %v71_v58  ;;  %v75_v6 = vld [vmem:[#allocation5 + $0x60] sm:$0xff]  ;;  %v76_v8 = vld [vmem:[#allocation5 + $0x68] sm:$0xff]  ;;  %v94_v12 = vld [vmem:[#allocation5 + $0xf0] sm:$0xff] }
  0x31   :  { %1263 = vmatprep.subr.bf16.mxu0 %v1541_v9  ;;  %1287 = vmatprep.subr.bf16.mxu1 %v1541_v9  ;;  %v1695_v11 = vpack.c.bf16 %v76_v8, %v75_v6  ;;  %v95_v13 = vld [vmem:[#allocation5 + $0xf8] sm:$0xff]  ;;  %v77_v15 = vld [vmem:[#allocation5 + $0x70] sm:$0xff] }
  0x32   :  { %v1701_v16 = vpack.c.bf16 %v95_v13, %v94_v12  ;;  %v78_v19 = vld [vmem:[#allocation5 + $0x78] sm:$0xff] }
  0x33   :  { %v1703_v20 = vpack.c.bf16 %v78_v19, %v77_v15 }
  0x34   :  { %1265 = vmatpush3.bf16.msra.mxu0 %v1626_v23  ;;  %1289 = vmatpush3.bf16.msra.mxu1 %v1630_v24 }
  0x35   :  { %1266 = vmatprep.subr.bf16.mxu0 %v1541_v9  ;;  %1290 = vmatprep.subr.bf16.mxu1 %v1541_v9 }
  0x38   :  { %1268 = vmatpush3.bf16.msra.mxu0 %v1634_v29  ;;  %1292 = vmatpush3.bf16.msra.mxu1 %v1638_v30 }
  0x39   :  { %1269 = vmatprep.subr.bf16.mxu0 %v1541_v9  ;;  %1293 = vmatprep.subr.bf16.mxu1 %v1541_v9 }
  0x3c   :  { %1271 = vmatpush3.bf16.msra.mxu0 %v1677_v59  ;;  %1295 = vmatpush3.bf16.msra.mxu1 %v1679_v61 }
  0x3d   :  { %1272 = vmatprep.subr.bf16.mxu0 %v1541_v9  ;;  %1296 = vmatprep.subr.bf16.mxu1 %v1541_v9 }
  0xb4   :  { %v45_v31 = vpop.xlane.xlu0 %44  ;;  %v247_v32 = vpop.xlane.xlu1 %246 }
  0xb8   :  { %v47_v33 = vpop.xlane.xlu0 %46  ;;  %v249_v34 = vpop.xlane.xlu1 %248 }
  0xb9   :  { %v48_v35 = vadd.f32 %v47_v33, %v45_v31  ;;  %v250_v36 = vadd.f32 %v249_v34, %v247_v32 }
  0xbb   :  { %v49_v37 = vmul.f32 0.00390625, %v48_v35  ;;  %v251_v38 = vmul.f32 0.00390625, %v250_v36 }
  0xbc   :  { %v445_v39 = vpop.xlane.xlu1 %444  ;;  %v443_v40 = vpop.xlane.xlu0 %442 }
  0xbd   :  { %v1646_v41 = vsub.f32 %v1596_v0, %v49_v37  ;;  %v1648_v42 = vsub.f32 %v43_v2, %v49_v37  ;;  %v1651_v43 = vsub.f32 %v1598_v1, %v251_v38  ;;  %v446_v44 = vadd.f32 %v445_v39, %v443_v40  ;;  %v73_v0 = vld [vmem:[#allocation5 + $0x50] sm:$0xff]  ;;  %v74_v2 = vld [vmem:[#allocation5 + $0x58] sm:$0xff] }
  0xbe   :  { %v1658_v48 = vsub.f32 %v1602_v3, %v251_v38  ;;  %v1685_v1 = vpack.c.bf16 %v91_v63, %v90_v62  ;;  %v1687_v3 = vpack.c.bf16 %v74_v2, %v73_v0 }
  0xbf   :  { %v55_v45 = vmul.f32 %v1648_v42, %v1648_v42  ;;  %v51_v46 = vmul.f32 %v1646_v41, %v1646_v41  ;;  %v447_v47 = vmul.f32 0.00390625, %v446_v44  ;;  %v253_v49 = vmul.f32 %v1651_v43, %v1651_v43 }
  0xc0   :  { %v257_v53 = vmul.f32 %v1658_v48, %v1658_v48  ;;  %1274 = vmatpush3.bf16.msra.mxu0 %v1685_v1  ;;  %1298 = vmatpush3.bf16.msra.mxu1 %v1687_v3 }
  0xc1   :  { %56 = vadd.xlane.f32.xlu1 %v55_v45  ;;  %52 = vadd.xlane.f32.xlu0 %v51_v46  ;;  %v1663_v50 = vsub.f32 %v1607_v5, %v447_v47  ;;  %v1668_v52 = vsub.f32 %v1605_v4, %v447_v47  ;;  %v92_v4 = vld [vmem:[#allocation5 + $0xe0] sm:$0xff]  ;;  %v93_v5 = vld [vmem:[#allocation5 + $0xe8] sm:$0xff] }
  0xc2   :  { %1275 = vmatprep.subr.bf16.mxu0 %v1541_v9  ;;  %1299 = vmatprep.subr.bf16.mxu1 %v1541_v9  ;;  %v1693_v7 = vpack.c.bf16 %v93_v5, %v92_v4 }
  0xc3   :  { %v449_v54 = vmul.f32 %v1663_v50, %v1663_v50  ;;  %v453_v55 = vmul.f32 %v1668_v52, %v1668_v52 }
  0xc4   :  { %1277 = vmatpush3.bf16.msra.mxu0 %v1693_v7  ;;  %1301 = vmatpush3.bf16.msra.mxu1 %v1695_v11 }
  0xc5   :  { %637 = vadd.xlane.f32.xlu0 %v1665_v51  ;;  %254 = vadd.xlane.f32.xlu1 %v253_v49 }
  0xc6   :  { %1278 = vmatprep.subr.bf16.mxu0 %v1541_v9  ;;  %1302 = vmatprep.subr.bf16.mxu1 %v1541_v9 }
  0xc8   :  { %1280 = vmatpush3.bf16.msra.mxu0 %v1701_v16  ;;  %1304 = vmatpush3.bf16.msra.mxu1 %v1703_v20 }
  0xc9   :  { %258 = vadd.xlane.f32.xlu0 %v257_v53  ;;  %450 = vadd.xlane.f32.xlu1 %v449_v54 }
  0xca   :  { %1305 = vmatprep.subr.bf16.mxu0 %v1541_v9  ;;  %1329 = vmatprep.subr.bf16.mxu1 %v1541_v9 }
  0xcd   :  { %454 = vadd.xlane.f32.xlu0 %v453_v55 }
 0x14e   :  { %v57_v22 = vpop.xlane.xlu1 %56  ;;  %v53_v25 = vpop.xlane.xlu0 %52 }
 0x14f   :  { %v58_v26 = vadd.f32 %v57_v22, %v53_v25 }
 0x151   :  { %v59_v27 = vmul.f32 0.00390625, %v58_v26 }
 0x152   :  { %v638_v28 = vpop.xlane.xlu0 %637  ;;  %v255_v39 = vpop.xlane.xlu1 %254 }
 0x153   :  { %v60_v31 = vadd.f32 1e-05, %v59_v27  ;;  %v639_v32 = vadd.f32 %v638_v28, %v638_v28 }
 0x155   :  { %1457 = vrsqrt.f32 %v60_v31  ;;  %v640_v33 = vmul.f32 0.00390625, %v639_v32 }
 0x156   :  { %v259_v40 = vpop.xlane.xlu0 %258  ;;  %v451_v49 = vpop.xlane.xlu1 %450 }
 0x157   :  { %v1714_v34 = vsub.f32 %v1665_v51, %v640_v33 }
 0x159   :  { %v642_v35 = vmul.f32 %v1714_v34, %v1714_v34 }
 0x15a   :  { %v455_v51 = vpop.xlane.xlu0 %454 }
 0x15b   :  { %643 = vadd.xlane.f32.xlu1 %v642_v35 }
 0x15f   :  { %v1458_v36 = vpop.eup %1457 }
 0x160   :  { %v79_v37 = vmul.f32 %v1458_v36, %v1648_v42  ;;  %v62_v38 = vmul.f32 %v1458_v36, %v1646_v41  ;;  %v260_v42 = vadd.f32 %v259_v40, %v255_v39 }
 0x162   :  { %1010 = vmatmul.mubr.f32.vlgmr.msra.gmra.mrb[0].mxu0 %v79_v37  ;;  %1045 = vmatmul.mubr.f32.vlgmr.msra.gmra.mrb[0].mxu1 %v62_v38  ;;  %v261_v41 = vmul.f32 0.00390625, %v260_v42 }
 0x163   :  { %1307 = vmatpush3.bf16.msra.mxu0 %v1613_v10  ;;  %1331 = vmatpush3.bf16.msra.mxu1 %v1615_v14 }
 0x164   :  { %1308 = vmatprep.subr.bf16.mxu0 %v1541_v9  ;;  %1332 = vmatprep.subr.bf16.mxu1 %v1541_v9  ;;  %v262_v44 = vadd.f32 1e-05, %v261_v41 }
 0x165   :  { %1079 = vmatprep.mubr.msk.f32.mxu0 %vm1542_vm0, %v1543_v21  ;;  %1114 = vmatprep.mubr.msk.f32.mxu1 %vm1542_vm0, %v1543_v21 }
 0x166   :  { %1459 = vrsqrt.f32 %v262_v44 }
 0x167   :  { %1310 = vmatpush3.bf16.msra.mxu0 %v1618_v17  ;;  %1334 = vmatpush3.bf16.msra.mxu1 %v1622_v18 }
 0x168   :  { %1311 = vmatprep.subr.bf16.mxu0 %v1541_v9  ;;  %1335 = vmatprep.subr.bf16.mxu1 %v1541_v9 }
 0x16b   :  { %1313 = vmatpush3.bf16.msra.mxu0 %v1626_v23  ;;  %1337 = vmatpush3.bf16.msra.mxu1 %v1630_v24 }
 0x16c   :  { %1314 = vmatprep.subr.bf16.mxu0 %v1541_v9  ;;  %1338 = vmatprep.subr.bf16.mxu1 %v1541_v9 }
 0x16f   :  { %1316 = vmatpush3.bf16.msra.mxu0 %v1634_v29  ;;  %1340 = vmatpush3.bf16.msra.mxu1 %v1638_v30 }
 0x170   :  { %1317 = vmatprep.subr.bf16.mxu0 %v1541_v9  ;;  %1341 = vmatprep.subr.bf16.mxu1 %v1541_v9  ;;  %v1460_v45 = vpop.eup %1459 }
 0x171   :  { %v281_v46 = vmul.f32 %v1460_v45, %v1658_v48  ;;  %v264_v47 = vmul.f32 %v1460_v45, %v1651_v43  ;;  %v456_v43 = vadd.f32 %v455_v51, %v451_v49 }
 0x173   :  { %1319 = vmatpush3.bf16.msra.mxu0 %v1677_v59  ;;  %1343 = vmatpush3.bf16.msra.mxu1 %v1679_v61  ;;  %v457_v48 = vmul.f32 0.00390625, %v456_v43 }
 0x174   :  { %1320 = vmatprep.subr.bf16.mxu0 %v1541_v9  ;;  %1344 = vmatprep.subr.bf16.mxu1 %v1541_v9 }
 0x175   :  { %v458_v53 = vadd.f32 1e-05, %v457_v48 }
 0x177   :  { %1322 = vmatpush3.bf16.msra.mxu0 %v1685_v1  ;;  %1346 = vmatpush3.bf16.msra.mxu1 %v1687_v3  ;;  %1461 = vrsqrt.f32 %v458_v53 }
 0x178   :  { %1323 = vmatprep.subr.bf16.mxu0 %v1541_v9  ;;  %1347 = vmatprep.subr.bf16.mxu1 %v1541_v9 }
 0x17b   :  { %1325 = vmatpush3.bf16.msra.mxu0 %v1693_v7  ;;  %1349 = vmatpush3.bf16.msra.mxu1 %v1695_v11 }
 0x17c   :  { %1326 = vmatprep.subr.bf16.mxu0 %v1541_v9  ;;  %1350 = vmatprep.subr.bf16.mxu1 %v1541_v9 }
 0x17f   :  { %1328 = vmatpush3.bf16.msra.mxu0 %v1701_v16  ;;  %1352 = vmatpush3.bf16.msra.mxu1 %v1703_v20 }
 0x180   :  { %1353 = vmatprep.subr.bf16.mxu0 %v1541_v9  ;;  %1377 = vmatprep.subr.bf16.mxu1 %v1541_v9 }
 0x181   :  { %v1462_v54 = vpop.eup %1461 }
 0x182   :  { %1080 = vmatmul.mubr.f32.vlgmr.msra.gmra.mrb[2].mxu0 %v281_v46  ;;  %1115 = vmatmul.mubr.f32.vlgmr.msra.gmra.mrb[2].mxu1 %v264_v47  ;;  %v477_v55 = vmul.f32 %v1462_v54, %v1668_v52  ;;  %v460_v56 = vmul.f32 %v1462_v54, %v1663_v50 }
 0x183   :  { %1355 = vmatpush3.bf16.msra.mxu0 %v1613_v10  ;;  %1379 = vmatpush3.bf16.msra.mxu1 %v1615_v14 }
 0x184   :  { %1356 = vmatprep.subr.bf16.mxu0 %v1541_v9  ;;  %1380 = vmatprep.subr.bf16.mxu1 %v1541_v9 }
 0x185   :  { %1149 = vmatprep.mubr.msk.f32.mxu0 %vm1542_vm0, %v1543_v21  ;;  %1184 = vmatprep.mubr.msk.f32.mxu1 %vm1542_vm0, %v1543_v21 }
 0x187   :  { %1358 = vmatpush3.bf16.msra.mxu0 %v1618_v17  ;;  %1382 = vmatpush3.bf16.msra.mxu1 %v1622_v18 }
 0x188   :  { %1359 = vmatprep.subr.bf16.mxu0 %v1541_v9  ;;  %1383 = vmatprep.subr.bf16.mxu1 %v1541_v9 }
 0x18b   :  { %1361 = vmatpush3.bf16.msra.mxu0 %v1626_v23  ;;  %1385 = vmatpush3.bf16.msra.mxu1 %v1630_v24 }
 0x18c   :  { %1362 = vmatprep.subr.bf16.mxu0 %v1541_v9  ;;  %1386 = vmatprep.subr.bf16.mxu1 %v1541_v9 }
 0x18f   :  { %1364 = vmatpush3.bf16.msra.mxu0 %v1634_v29  ;;  %1388 = vmatpush3.bf16.msra.mxu1 %v1638_v30 }
 0x190   :  { %1365 = vmatprep.subr.bf16.mxu0 %v1541_v9  ;;  %1389 = vmatprep.subr.bf16.mxu1 %v1541_v9 }
 0x193   :  { %1367 = vmatpush3.bf16.msra.mxu0 %v1677_v59  ;;  %1391 = vmatpush3.bf16.msra.mxu1 %v1679_v61 }
 0x194   :  { %1368 = vmatprep.subr.bf16.mxu0 %v1541_v9  ;;  %1392 = vmatprep.subr.bf16.mxu1 %v1541_v9 }
 0x197   :  { %1370 = vmatpush3.bf16.msra.mxu0 %v1685_v1  ;;  %1394 = vmatpush3.bf16.msra.mxu1 %v1687_v3 }
 0x198   :  { %1371 = vmatprep.subr.bf16.mxu0 %v1541_v9  ;;  %1395 = vmatprep.subr.bf16.mxu1 %v1541_v9 }
 0x19b   :  { %1373 = vmatpush3.bf16.msra.mxu0 %v1693_v7  ;;  %1397 = vmatpush3.bf16.msra.mxu1 %v1695_v11 }
 0x19c   :  { %1374 = vmatprep.subr.bf16.mxu0 %v1541_v9  ;;  %1398 = vmatprep.subr.bf16.mxu1 %v1541_v9 }
 0x19f   :  { %1376 = vmatpush3.bf16.msra.mxu0 %v1701_v16  ;;  %1400 = vmatpush3.bf16.msra.mxu1 %v1703_v20 }
 0x1a0   :  { %1401 = vmatprep.subr.bf16.mxu0 %v1541_v9  ;;  %1425 = vmatprep.subr.bf16.mxu1 %v1541_v9 }
 0x1a2   :  { %1150 = vmatmul.mubr.f32.vlgmr.msra.gmra.mrb[4].mxu0 %v477_v55  ;;  %1185 = vmatmul.mubr.f32.vlgmr.msra.gmra.mrb[4].mxu1 %v460_v56 }
 0x1a3   :  { %1403 = vmatpush3.bf16.msra.mxu0 %v1613_v10  ;;  %1427 = vmatpush3.bf16.msra.mxu1 %v1615_v14 }
 0x1a4   :  { %1404 = vmatprep.subr.bf16.mxu0 %v1541_v9  ;;  %1428 = vmatprep.subr.bf16.mxu1 %v1541_v9 }
 0x1a5   :  { %1219 = vmatprep.mubr.msk.f32.mxu0 %vm1542_vm0, %v1543_v21  ;;  %1254 = vmatprep.mubr.msk.f32.mxu1 %vm1542_vm0, %v1543_v21 }
 0x1a7   :  { %1406 = vmatpush3.bf16.msra.mxu0 %v1618_v17  ;;  %1430 = vmatpush3.bf16.msra.mxu1 %v1622_v18 }
 0x1a8   :  { %1407 = vmatprep.subr.bf16.mxu0 %v1541_v9  ;;  %1431 = vmatprep.subr.bf16.mxu1 %v1541_v9 }
 0x1ab   :  { %1409 = vmatpush3.bf16.msra.mxu0 %v1626_v23  ;;  %1433 = vmatpush3.bf16.msra.mxu1 %v1630_v24 }
 0x1ac   :  { %1410 = vmatprep.subr.bf16.mxu0 %v1541_v9  ;;  %1434 = vmatprep.subr.bf16.mxu1 %v1541_v9 }
 0x1af   :  { %1412 = vmatpush3.bf16.msra.mxu0 %v1634_v29  ;;  %1436 = vmatpush3.bf16.msra.mxu1 %v1638_v30  ;;  %v840_v30 = vld [vmem:[%s1848_s2] ss:$0 sm:$0xff]  ;;  %s1544_s2 = smov [#allocation7]  }
 0x1b0   :  { %1413 = vmatprep.subr.bf16.mxu0 %v1541_v9  ;;  %1437 = vmatprep.subr.bf16.mxu1 %v1541_v9  ;;  %s830_s11 = sshll.u32 %s1544_s2, 4  ;;  %s831_s11 = int_to_ptr.vmem [resolvable:$true] %s830_s11 }
 0x1b1   :  { %s1509_s12 = scalar_lea.vmem %s831_s11, 512  ;;  %p1514_p3 = scmp.lt.s32.totalorder %s831_s11, %s831_s11 }
 0x1b2   :  { %p1510_p2 = scmp.ne.s32.totalorder %s831_s11, %s1509_s12  ;;  %p1515_p4 = scmp.lt.s32.totalorder %s1509_s12, %s1509_s12 }
 0x1b3   :  { %1415 = vmatpush3.bf16.msra.mxu0 %v1677_v59  ;;  %1439 = vmatpush3.bf16.msra.mxu1 %v1679_v61 }
 0x1b4   :  { %1416 = vmatprep.subr.bf16.mxu0 %v1541_v9  ;;  %1440 = vmatprep.subr.bf16.mxu1 %v1541_v9  ;;  %p1516_p5 = por %p1515_p4, %p1514_p3 }
 0x1b6   :  { %p1517_p6 = pnand %p1516_p5, %p1510_p2 }
 0x1b7   :  { %1418 = vmatpush3.bf16.msra.mxu0 %v1685_v1  ;;  %1442 = vmatpush3.bf16.msra.mxu1 %v1687_v3 }
 0x1b8   :  { %1419 = vmatprep.subr.bf16.mxu0 %v1541_v9  ;;  %1443 = vmatprep.subr.bf16.mxu1 %v1541_v9 }
 0x1bb   :  { %1421 = vmatpush3.bf16.msra.mxu0 %v1693_v7  ;;  %1445 = vmatpush3.bf16.msra.mxu1 %v1695_v11 }
 0x1bc   :  { %1422 = vmatprep.subr.bf16.mxu0 %v1541_v9  ;;  %1446 = vmatprep.subr.bf16.mxu1 %v1541_v9 }
 0x1bf   :  { %1424 = vmatpush3.bf16.msra.mxu0 %v1701_v16  ;;  %1448 = vmatpush3.bf16.msra.mxu1 %v1703_v20 }
 0x1e8   :  { %v644_v10 = vpop.xlane.xlu1 %643 }
 0x1e9   :  { %v645_v14 = vadd.f32 %v644_v10, %v644_v10 }
 0x1eb   :  { %v646_v17 = vmul.f32 0.00390625, %v645_v14 }
 0x1ed   :  { %v647_v18 = vadd.f32 1e-05, %v646_v17 }
 0x1ef   :  { %1463 = vrsqrt.f32 %v647_v18 }
 0x1f9   :  { %v1464_v23 = vpop.eup %1463 }
 0x1fa   :  { %v649_v24 = vmul.f32 %v1464_v23, %v1714_v34 }
 0x1fc   :  { %1220 = vmatmul.mubr.f32.vlgmr.msra.gmra.mrb[6].mxu0 %v649_v24  ;;  %1255 = vmatmul.mubr.f32.vlgmr.msra.gmra.mrb[6].mxu1 %v649_v24 }
 0x235   :  { %v162_v29 = vpop.f32.mrb[0].mxu0  ;;  %v232_v9 = vpop.f32.mrb[0].mxu1 }
 0x236   :  { %v233_v50 = vadd.f32 %v232_v9, %v162_v29  ;;  %v1011_v52 = vpop.f32.mrb[1].mxu0  ;;  %v1046_v57 = vpop.f32.mrb[1].mxu1 }
 0x238   :  { %v242_v58 = vadd.f32 %v840_v30, %v233_v50 }
 0x23a   :  { %243 = vst [vmem:[#allocation7] sm:$0xff] %v242_v58 }
 0x255   :  { %v364_v59 = vpop.f32.mrb[2].mxu0  ;;  %v434_v60 = vpop.f32.mrb[2].mxu1 }
 0x256   :  { %v435_v61 = vadd.f32 %v434_v60, %v364_v59  ;;  %v1081_v62 = vpop.f32.mrb[3].mxu0  ;;  %v1116_v63 = vpop.f32.mrb[3].mxu1 }
 0x258   :  { %v438_v0 = vadd.f32 %v840_v30, %v435_v61 }
 0x25a   :  { %439 = vst [vmem:[#allocation7 + $0x8] sm:$0xff] %v438_v0 }
 0x275   :  { %v560_v1 = vpop.f32.mrb[4].mxu0  ;;  %v630_v2 = vpop.f32.mrb[4].mxu1 }
 0x276   :  { %v631_v3 = vadd.f32 %v630_v2, %v560_v1  ;;  %v1151_v4 = vpop.f32.mrb[5].mxu0  ;;  %v1186_v5 = vpop.f32.mrb[5].mxu1 }
 0x278   :  { %v634_v6 = vadd.f32 %v840_v30, %v631_v3 }
 0x27a   :  { %635 = vst [vmem:[#allocation7 + $0x10] sm:$0xff] %v634_v6 }
 0x2cf   :  { %v748_v7 = vpop.f32.mrb[6].mxu0  ;;  %v818_v8 = vpop.f32.mrb[6].mxu1 }
 0x2d0   :  { %v819_v11 = vadd.f32 %v818_v8, %v748_v7  ;;  %v1221_v12 = vpop.f32.mrb[7].mxu0  ;;  %v1256_v13 = vpop.f32.mrb[7].mxu1 }
 0x2d2   :  { %v822_v15 = vadd.f32 %v840_v30, %v819_v11 }
 0x2d4   :  { %823 = vst [vmem:[#allocation7 + $0x18] sm:$0xff] %v822_v15 }
 0x2d5   :  { %1520 = shalt.err (!%p1517_p6)
}
 0x2d6   :  { %s1521_s15 = scalar_lea.hbm %s1849_s3, 512 }
 0x2d7   :  { %p1522_p7 = scmp.ne.s32.totalorder %s1849_s3, %s1521_s15  ;;  %p1525_p8 = scmp.lt.u32.totalorder %s1521_s15, %s1849_s3 }
 0x2d9   :  { %p1527_p9 = pnand %p1525_p8, %p1522_p7 }
 0x2db   :  { %1530 = shalt.err (!%p1527_p9)
}
 0x2dc   :  { %833 = dma.vmem_to_hbm [thread:$0]  %s831_s11, 512, %s1849_s3, [#allocation4]  }
 0x2dd   :  { %1535 = dma.done.wait [#allocation4], 512  }
 0x2de   :  { %1536 = vsyncadd [#allocation4], 4294966784 }
 0x2df   :  { %837 = vsyncpa [#allocation3], 1 }
 0x2e0   :  { %838 = vsyncpa [#allocation6], 1 }
 0x2e1   :  { %839 = vsyncpa [#allocation4], 1 }

// kernel: tpu_custom_call.1
= control target key start
LH: loop header
LB: loop body
LE: loop exit
PB: predicated region body
PF: predicated region fallthrough
CT: control target
= control target key end

     0   :  { %8 = vsyncpa [#allocation3], 0  ;;  %s1846_s0 = inlined_call_operand.hbm [shape: f32[8,896], index: 0, kind: input, shape index: {}]   ;;  %s1847_s1 = inlined_call_operand.hbm [shape: f32[256,128], index: 1, kind: input, shape index: {}]   ;;  %s1848_s2 = inlined_call_operand.vmem [shape: f32[1,128], index: 2, kind: input, shape index: {}]   ;;  %s1849_s3 = inlined_call_operand.hbm [shape: f32[8,512], index: 3, kind: output, shape index: {}]  }
   0x1   :  { %9 = vsyncpa [#allocation6], 0 }
   0x2   :  { %10 = vsyncpa [#allocation4], 0  ;;  %s1537_s12 = smov [#allocation2]   ;;  %s1538_s14 = smov [#allocation5]  }
   0x3   :  { %s17_s13 = sshll.u32 %s1537_s12, 4  ;;  %s26_s15 = sshll.u32 %s1538_s14, 4  ;;  %s18_s13 = int_to_ptr.vmem [resolvable:$true] %s17_s13  ;;  %s1565_s15 = int_to_ptr.vmem [resolvable:$true] %s26_s15 }
   0x4   :  { %s1465_s18 = scalar_lea.hbm %s1846_s0, 896 }
   0x5   :  { %p1466_p0 = scmp.ne.s32.totalorder %s1846_s0, %s1465_s18  ;;  %p1469_p1 = scmp.lt.u32.totalorder %s1465_s18, %s1846_s0 }
   0x7   :  { %p1471_p2 = pnand %p1469_p1, %p1466_p0 }
   0x9   :  { %1474 = shalt.err (!%p1471_p2)
}
   0xa   :  { %s1475_s23 = scalar_lea.vmem %s18_s13, 896  ;;  %p1480_p4 = scmp.lt.s32.totalorder %s18_s13, %s18_s13 }
   0xb   :  { %p1476_p3 = scmp.ne.s32.totalorder %s18_s13, %s1475_s23  ;;  %p1481_p5 = scmp.lt.s32.totalorder %s1475_s23, %s1475_s23 }
   0xd   :  { %p1482_p6 = por %p1481_p5, %p1480_p4 }
   0xf   :  { %p1483_p7 = pnand %p1482_p6, %p1476_p3 }
  0x11   :  { %1486 = shalt.err (!%p1483_p7)
}
  0x12   :  { %20 = dma.hbm_to_vmem [thread:$0]  %s1846_s0, 896, %s18_s13, [#allocation3]  }
  0x13   :  { %s1487_s28 = scalar_lea.hbm %s1847_s1, 4096 }
  0x14   :  { %p1488_p8 = scmp.ne.s32.totalorder %s1847_s1, %s1487_s28  ;;  %p1491_p9 = scmp.lt.u32.totalorder %s1487_s28, %s1847_s1 }
  0x16   :  { %p1493_p10 = pnand %p1491_p9, %p1488_p8 }
  0x18   :  { %1496 = shalt.err (!%p1493_p10)
}
  0x19   :  { %s1497_s6 = scalar_lea.vmem %s1565_s15, 4096  ;;  %p1502_p12 = scmp.lt.s32.totalorder %s1565_s15, %s1565_s15 }
  0x1a   :  { %p1498_p11 = scmp.ne.s32.totalorder %s1565_s15, %s1497_s6  ;;  %p1503_p13 = scmp.lt.s32.totalorder %s1497_s6, %s1497_s6 }
  0x1c   :  { %p1504_p0 = por %p1503_p13, %p1502_p12 }
  0x1e   :  { %p1505_p1 = pnand %p1504_p0, %p1498_p11 }
  0x20   :  { %1508 = shalt.err (!%p1505_p1)
}
  0x21   :  { %s1539_s0 = smov 128   ;;  %s1540_s7 = smov 8  }
  0x22   :  { %32 = dma.hbm_to_vmem [thread:$0]  %s1847_s1, 4096, %s1565_s15, [#allocation6], %s1539_s0, %s1539_s0, %s1540_s7  }
  0x23   :  { %1531 = dma.done.wait [#allocation3], 896  }
  0x24   :  { %1532 = vsyncadd [#allocation3], 4294966400 }
  0x25   :  { %1533 = dma.done.wait [#allocation6], 4096  }
  0x26   :  { %1534 = vsyncadd [#allocation6], 4294963200  ;;  %v1596_v0 = vld [vmem:[#allocation2] sm:$0xff]  ;;  %v1598_v1 = vld [vmem:[#allocation2 + $0x10] sm:$0xff]  ;;  %v1541_v9 = vmov 0.0|0.0   ;;  %vm1542_vm0 = vmmov 0  }
  0x27   :  { %44 = vadd.xlane.f32.xlu0 %v1596_v0  ;;  %246 = vadd.xlane.f32.xlu1 %v1598_v1  ;;  %v43_v2 = vld [vmem:[#allocation2 + $0x8] sm:$0xff]  ;;  %v1602_v3 = vld [vmem:[#allocation2 + $0x18] sm:$0xff]  ;;  %v1607_v5 = vld [vmem:[#allocation2 + $0x20] sm:$0xff] }
  0x28   :  { %v1605_v4 = vld [vmem:[#allocation2 + $0x28] sm:$0xff]  ;;  %v80_v6 = vld [vmem:[#allocation5 + $0x80] sm:$0xff]  ;;  %v81_v7 = vld [vmem:[#allocation5 + $0x88] sm:$0xff]  ;;  %1257 = vmatprep.subr.bf16.mxu0 %v1541_v9  ;;  %1281 = vmatprep.subr.bf16.mxu1 %v1541_v9 }
  0x29   :  { %v63_v8 = vld [vmem:[#allocation5] sm:$0xff]  ;;  %v1613_v10 = vpack.c.bf16 %v81_v7, %v80_v6  ;;  %v64_v11 = vld [vmem:[#allocation5 + $0x8] sm:$0xff]  ;;  %v82_v12 = vld [vmem:[#allocation5 + $0x90] sm:$0xff] }
  0x2a   :  { %v83_v13 = vld [vmem:[#allocation5 + $0x98] sm:$0xff]  ;;  %v1615_v14 = vpack.c.bf16 %v64_v11, %v63_v8  ;;  %v65_v15 = vld [vmem:[#allocation5 + $0x10] sm:$0xff]  ;;  %v84_v19 = vld [vmem:[#allocation5 + $0xa0] sm:$0xff] }
  0x2b   :  { %46 = vadd.xlane.f32.xlu0 %v43_v2  ;;  %248 = vadd.xlane.f32.xlu1 %v1602_v3  ;;  %v66_v16 = vld [vmem:[#allocation5 + $0x18] sm:$0xff]  ;;  %v1618_v17 = vpack.c.bf16 %v83_v13, %v82_v12  ;;  %v85_v20 = vld [vmem:[#allocation5 + $0xa8] sm:$0xff]  ;;  %v67_v21 = vld [vmem:[#allocation5 + $0x20] sm:$0xff] }
  0x2c   :  { %1259 = vmatpush3.bf16.msra.mxu0 %v1613_v10  ;;  %1283 = vmatpush3.bf16.msra.mxu1 %v1615_v14  ;;  %v1622_v18 = vpack.c.bf16 %v66_v16, %v65_v15  ;;  %v68_v22 = vld [vmem:[#allocation5 + $0x28] sm:$0xff]  ;;  %v1626_v23 = vpack.c.bf16 %v85_v20, %v84_v19  ;;  %v86_v25 = vld [vmem:[#allocation5 + $0xb0] sm:$0xff]  ;;  %v87_v26 = vld [vmem:[#allocation5 + $0xb8] sm:$0xff] }
  0x2d   :  { %1260 = vmatprep.subr.bf16.mxu0 %v1541_v9  ;;  %1284 = vmatprep.subr.bf16.mxu1 %v1541_v9  ;;  %v1630_v24 = vpack.c.bf16 %v68_v22, %v67_v21  ;;  %v69_v27 = vld [vmem:[#allocation5 + $0x30] sm:$0xff]  ;;  %v70_v28 = vld [vmem:[#allocation5 + $0x38] sm:$0xff]  ;;  %v1634_v29 = vpack.c.bf16 %v87_v26, %v86_v25  ;;  %v88_v56 = vld [vmem:[#allocation5 + $0xc0] sm:$0xff]  ;;  %v1543_v21 = vmov 0.0  }
  0x2e   :  { %v1638_v30 = vpack.c.bf16 %v70_v28, %v69_v27  ;;  %v1665_v51 = vld [vmem:[#allocation2 + $0x30] sm:$0xff]  ;;  %v89_v57 = vld [vmem:[#allocation5 + $0xc8] sm:$0xff]  ;;  %v71_v58 = vld [vmem:[#allocation5 + $0x40] sm:$0xff]  ;;  %1009 = vmatprep.mubr.msk.f32.mxu0 %vm1542_vm0, %v1543_v21  ;;  %1044 = vmatprep.mubr.msk.f32.mxu1 %vm1542_vm0, %v1543_v21 }
  0x2f   :  { %444 = vadd.xlane.f32.xlu1 %v1605_v4  ;;  %442 = vadd.xlane.f32.xlu0 %v1607_v5  ;;  %v1677_v59 = vpack.c.bf16 %v89_v57, %v88_v56  ;;  %v72_v60 = vld [vmem:[#allocation5 + $0x48] sm:$0xff]  ;;  %v90_v62 = vld [vmem:[#allocation5 + $0xd0] sm:$0xff]  ;;  %v91_v63 = vld [vmem:[#allocation5 + $0xd8] sm:$0xff] }
  0x30   :  { %1262 = vmatpush3.bf16.msra.mxu0 %v1618_v17  ;;  %1286 = vmatpush3.bf16.msra.mxu1 %v1622_v18  ;;  %v1679_v61 = vpack.c.bf16 %v72_v60, %v71_v58  ;;  %v75_v6 = vld [vmem:[#allocation5 + $0x60] sm:$0xff]  ;;  %v76_v8 = vld [vmem:[#allocation5 + $0x68] sm:$0xff]  ;;  %v94_v12 = vld [vmem:[#allocation5 + $0xf0] sm:$0xff] }
  0x31   :  { %1263 = vmatprep.subr.bf16.mxu0 %v1541_v9  ;;  %1287 = vmatprep.subr.bf16.mxu1 %v1541_v9  ;;  %v1695_v11 = vpack.c.bf16 %v76_v8, %v75_v6  ;;  %v95_v13 = vld [vmem:[#allocation5 + $0xf8] sm:$0xff]  ;;  %v77_v15 = vld [vmem:[#allocation5 + $0x70] sm:$0xff] }
  0x32   :  { %v1701_v16 = vpack.c.bf16 %v95_v13, %v94_v12  ;;  %v78_v19 = vld [vmem:[#allocation5 + $0x78] sm:$0xff] }
  0x33   :  { %v1703_v20 = vpack.c.bf16 %v78_v19, %v77_v15 }
  0x34   :  { %1265 = vmatpush3.bf16.msra.mxu0 %v1626_v23  ;;  %1289 = vmatpush3.bf16.msra.mxu1 %v1630_v24 }
  0x35   :  { %1266 = vmatprep.subr.bf16.mxu0 %v1541_v9  ;;  %1290 = vmatprep.subr.bf16.mxu1 %v1541_v9 }
  0x38   :  { %1268 = vmatpush3.bf16.msra.mxu0 %v1634_v29  ;;  %1292 = vmatpush3.bf16.msra.mxu1 %v1638_v30 }
  0x39   :  { %1269 = vmatprep.subr.bf16.mxu0 %v1541_v9  ;;  %1293 = vmatprep.subr.bf16.mxu1 %v1541_v9 }
  0x3c   :  { %1271 = vmatpush3.bf16.msra.mxu0 %v1677_v59  ;;  %1295 = vmatpush3.bf16.msra.mxu1 %v1679_v61 }
  0x3d   :  { %1272 = vmatprep.subr.bf16.mxu0 %v1541_v9  ;;  %1296 = vmatprep.subr.bf16.mxu1 %v1541_v9 }
  0xb4   :  { %v45_v31 = vpop.xlane.xlu0 %44  ;;  %v247_v32 = vpop.xlane.xlu1 %246 }
  0xb8   :  { %v47_v33 = vpop.xlane.xlu0 %46  ;;  %v249_v34 = vpop.xlane.xlu1 %248 }
  0xb9   :  { %v48_v35 = vadd.f32 %v47_v33, %v45_v31  ;;  %v250_v36 = vadd.f32 %v249_v34, %v247_v32 }
  0xbb   :  { %v49_v37 = vmul.f32 0.00390625, %v48_v35  ;;  %v251_v38 = vmul.f32 0.00390625, %v250_v36 }
  0xbc   :  { %v445_v39 = vpop.xlane.xlu1 %444  ;;  %v443_v40 = vpop.xlane.xlu0 %442 }
  0xbd   :  { %v1646_v41 = vsub.f32 %v1596_v0, %v49_v37  ;;  %v1648_v42 = vsub.f32 %v43_v2, %v49_v37  ;;  %v1651_v43 = vsub.f32 %v1598_v1, %v251_v38  ;;  %v446_v44 = vadd.f32 %v445_v39, %v443_v40  ;;  %v73_v0 = vld [vmem:[#allocation5 + $0x50] sm:$0xff]  ;;  %v74_v2 = vld [vmem:[#allocation5 + $0x58] sm:$0xff] }
  0xbe   :  { %v1658_v48 = vsub.f32 %v1602_v3, %v251_v38  ;;  %v1685_v1 = vpack.c.bf16 %v91_v63, %v90_v62  ;;  %v1687_v3 = vpack.c.bf16 %v74_v2, %v73_v0 }
  0xbf   :  { %v55_v45 = vmul.f32 %v1648_v42, %v1648_v42  ;;  %v51_v46 = vmul.f32 %v1646_v41, %v1646_v41  ;;  %v447_v47 = vmul.f32 0.00390625, %v446_v44  ;;  %v253_v49 = vmul.f32 %v1651_v43, %v1651_v43 }
  0xc0   :  { %v257_v53 = vmul.f32 %v1658_v48, %v1658_v48  ;;  %1274 = vmatpush3.bf16.msra.mxu0 %v1685_v1  ;;  %1298 = vmatpush3.bf16.msra.mxu1 %v1687_v3 }
  0xc1   :  { %56 = vadd.xlane.f32.xlu1 %v55_v45  ;;  %52 = vadd.xlane.f32.xlu0 %v51_v46  ;;  %v1663_v50 = vsub.f32 %v1607_v5, %v447_v47  ;;  %v1668_v52 = vsub.f32 %v1605_v4, %v447_v47  ;;  %v92_v4 = vld [vmem:[#allocation5 + $0xe0] sm:$0xff]  ;;  %v93_v5 = vld [vmem:[#allocation5 + $0xe8] sm:$0xff] }
  0xc2   :  { %1275 = vmatprep.subr.bf16.mxu0 %v1541_v9  ;;  %1299 = vmatprep.subr.bf16.mxu1 %v1541_v9  ;;  %v1693_v7 = vpack.c.bf16 %v93_v5, %v92_v4 }
  0xc3   :  { %v449_v54 = vmul.f32 %v1663_v50, %v1663_v50  ;;  %v453_v55 = vmul.f32 %v1668_v52, %v1668_v52 }
  0xc4   :  { %1277 = vmatpush3.bf16.msra.mxu0 %v1693_v7  ;;  %1301 = vmatpush3.bf16.msra.mxu1 %v1695_v11 }
  0xc5   :  { %637 = vadd.xlane.f32.xlu0 %v1665_v51  ;;  %254 = vadd.xlane.f32.xlu1 %v253_v49 }
  0xc6   :  { %1278 = vmatprep.subr.bf16.mxu0 %v1541_v9  ;;  %1302 = vmatprep.subr.bf16.mxu1 %v1541_v9 }
  0xc8   :  { %1280 = vmatpush3.bf16.msra.mxu0 %v1701_v16  ;;  %1304 = vmatpush3.bf16.msra.mxu1 %v1703_v20 }
  0xc9   :  { %258 = vadd.xlane.f32.xlu0 %v257_v53  ;;  %450 = vadd.xlane.f32.xlu1 %v449_v54 }
  0xca   :  { %1305 = vmatprep.subr.bf16.mxu0 %v1541_v9  ;;  %1329 = vmatprep.subr.bf16.mxu1 %v1541_v9 }
  0xcd   :  { %454 = vadd.xlane.f32.xlu0 %v453_v55 }
 0x14e   :  { %v57_v22 = vpop.xlane.xlu1 %56  ;;  %v53_v25 = vpop.xlane.xlu0 %52 }
 0x14f   :  { %v58_v26 = vadd.f32 %v57_v22, %v53_v25 }
 0x151   :  { %v59_v27 = vmul.f32 0.00390625, %v58_v26 }
 0x152   :  { %v638_v28 = vpop.xlane.xlu0 %637  ;;  %v255_v39 = vpop.xlane.xlu1 %254 }
 0x153   :  { %v60_v31 = vadd.f32 1e-05, %v59_v27  ;;  %v639_v32 = vadd.f32 %v638_v28, %v638_v28 }
 0x155   :  { %1457 = vrsqrt.f32 %v60_v31  ;;  %v640_v33 = vmul.f32 0.00390625, %v639_v32 }
 0x156   :  { %v259_v40 = vpop.xlane.xlu0 %258  ;;  %v451_v49 = vpop.xlane.xlu1 %450 }
 0x157   :  { %v1714_v34 = vsub.f32 %v1665_v51, %v640_v33 }
 0x159   :  { %v642_v35 = vmul.f32 %v1714_v34, %v1714_v34 }
 0x15a   :  { %v455_v51 = vpop.xlane.xlu0 %454 }
 0x15b   :  { %643 = vadd.xlane.f32.xlu1 %v642_v35 }
 0x15f   :  { %v1458_v36 = vpop.eup %1457 }
 0x160   :  { %v79_v37 = vmul.f32 %v1458_v36, %v1648_v42  ;;  %v62_v38 = vmul.f32 %v1458_v36, %v1646_v41  ;;  %v260_v42 = vadd.f32 %v259_v40, %v255_v39 }
 0x162   :  { %1010 = vmatmul.mubr.f32.vlgmr.msra.gmra.mrb[0].mxu0 %v79_v37  ;;  %1045 = vmatmul.mubr.f32.vlgmr.msra.gmra.mrb[0].mxu1 %v62_v38  ;;  %v261_v41 = vmul.f32 0.00390625, %v260_v42 }
 0x163   :  { %1307 = vmatpush3.bf16.msra.mxu0 %v1613_v10  ;;  %1331 = vmatpush3.bf16.msra.mxu1 %v1615_v14 }
 0x164   :  { %1308 = vmatprep.subr.bf16.mxu0 %v1541_v9  ;;  %1332 = vmatprep.subr.bf16.mxu1 %v1541_v9  ;;  %v262_v44 = vadd.f32 1e-05, %v261_v41 }
 0x165   :  { %1079 = vmatprep.mubr.msk.f32.mxu0 %vm1542_vm0, %v1543_v21  ;;  %1114 = vmatprep.mubr.msk.f32.mxu1 %vm1542_vm0, %v1543_v21 }
 0x166   :  { %1459 = vrsqrt.f32 %v262_v44 }
 0x167   :  { %1310 = vmatpush3.bf16.msra.mxu0 %v1618_v17  ;;  %1334 = vmatpush3.bf16.msra.mxu1 %v1622_v18 }
 0x168   :  { %1311 = vmatprep.subr.bf16.mxu0 %v1541_v9  ;;  %1335 = vmatprep.subr.bf16.mxu1 %v1541_v9 }
 0x16b   :  { %1313 = vmatpush3.bf16.msra.mxu0 %v1626_v23  ;;  %1337 = vmatpush3.bf16.msra.mxu1 %v1630_v24 }
 0x16c   :  { %1314 = vmatprep.subr.bf16.mxu0 %v1541_v9  ;;  %1338 = vmatprep.subr.bf16.mxu1 %v1541_v9 }
 0x16f   :  { %1316 = vmatpush3.bf16.msra.mxu0 %v1634_v29  ;;  %1340 = vmatpush3.bf16.msra.mxu1 %v1638_v30 }
 0x170   :  { %1317 = vmatprep.subr.bf16.mxu0 %v1541_v9  ;;  %1341 = vmatprep.subr.bf16.mxu1 %v1541_v9  ;;  %v1460_v45 = vpop.eup %1459 }
 0x171   :  { %v281_v46 = vmul.f32 %v1460_v45, %v1658_v48  ;;  %v264_v47 = vmul.f32 %v1460_v45, %v1651_v43  ;;  %v456_v43 = vadd.f32 %v455_v51, %v451_v49 }
 0x173   :  { %1319 = vmatpush3.bf16.msra.mxu0 %v1677_v59  ;;  %1343 = vmatpush3.bf16.msra.mxu1 %v1679_v61  ;;  %v457_v48 = vmul.f32 0.00390625, %v456_v43 }
 0x174   :  { %1320 = vmatprep.subr.bf16.mxu0 %v1541_v9  ;;  %1344 = vmatprep.subr.bf16.mxu1 %v1541_v9 }
 0x175   :  { %v458_v53 = vadd.f32 1e-05, %v457_v48 }
 0x177   :  { %1322 = vmatpush3.bf16.msra.mxu0 %v1685_v1  ;;  %1346 = vmatpush3.bf16.msra.mxu1 %v1687_v3  ;;  %1461 = vrsqrt.f32 %v458_v53 }
 0x178   :  { %1323 = vmatprep.subr.bf16.mxu0 %v1541_v9  ;;  %1347 = vmatprep.subr.bf16.mxu1 %v1541_v9 }
 0x17b   :  { %1325 = vmatpush3.bf16.msra.mxu0 %v1693_v7  ;;  %1349 = vmatpush3.bf16.msra.mxu1 %v1695_v11 }
 0x17c   :  { %1326 = vmatprep.subr.bf16.mxu0 %v1541_v9  ;;  %1350 = vmatprep.subr.bf16.mxu1 %v1541_v9 }
 0x17f   :  { %1328 = vmatpush3.bf16.msra.mxu0 %v1701_v16  ;;  %1352 = vmatpush3.bf16.msra.mxu1 %v1703_v20 }
 0x180   :  { %1353 = vmatprep.subr.bf16.mxu0 %v1541_v9  ;;  %1377 = vmatprep.subr.bf16.mxu1 %v1541_v9 }
 0x181   :  { %v1462_v54 = vpop.eup %1461 }
 0x182   :  { %1080 = vmatmul.mubr.f32.vlgmr.msra.gmra.mrb[2].mxu0 %v281_v46  ;;  %1115 = vmatmul.mubr.f32.vlgmr.msra.gmra.mrb[2].mxu1 %v264_v47  ;;  %v477_v55 = vmul.f32 %v1462_v54, %v1668_v52  ;;  %v460_v56 = vmul.f32 %v1462_v54, %v1663_v50 }
 0x183   :  { %1355 = vmatpush3.bf16.msra.mxu0 %v1613_v10  ;;  %1379 = vmatpush3.bf16.msra.mxu1 %v1615_v14 }
 0x184   :  { %1356 = vmatprep.subr.bf16.mxu0 %v1541_v9  ;;  %1380 = vmatprep.subr.bf16.mxu1 %v1541_v9 }
 0x185   :  { %1149 = vmatprep.mubr.msk.f32.mxu0 %vm1542_vm0, %v1543_v21  ;;  %1184 = vmatprep.mubr.msk.f32.mxu1 %vm1542_vm0, %v1543_v21 }
 0x187   :  { %1358 = vmatpush3.bf16.msra.mxu0 %v1618_v17  ;;  %1382 = vmatpush3.bf16.msra.mxu1 %v1622_v18 }
 0x188   :  { %1359 = vmatprep.subr.bf16.mxu0 %v1541_v9  ;;  %1383 = vmatprep.subr.bf16.mxu1 %v1541_v9 }
 0x18b   :  { %1361 = vmatpush3.bf16.msra.mxu0 %v1626_v23  ;;  %1385 = vmatpush3.bf16.msra.mxu1 %v1630_v24 }
 0x18c   :  { %1362 = vmatprep.subr.bf16.mxu0 %v1541_v9  ;;  %1386 = vmatprep.subr.bf16.mxu1 %v1541_v9 }
 0x18f   :  { %1364 = vmatpush3.bf16.msra.mxu0 %v1634_v29  ;;  %1388 = vmatpush3.bf16.msra.mxu1 %v1638_v30 }
 0x190   :  { %1365 = vmatprep.subr.bf16.mxu0 %v1541_v9  ;;  %1389 = vmatprep.subr.bf16.mxu1 %v1541_v9 }
 0x193   :  { %1367 = vmatpush3.bf16.msra.mxu0 %v1677_v59  ;;  %1391 = vmatpush3.bf16.msra.mxu1 %v1679_v61 }
 0x194   :  { %1368 = vmatprep.subr.bf16.mxu0 %v1541_v9  ;;  %1392 = vmatprep.subr.bf16.mxu1 %v1541_v9 }
 0x197   :  { %1370 = vmatpush3.bf16.msra.mxu0 %v1685_v1  ;;  %1394 = vmatpush3.bf16.msra.mxu1 %v1687_v3 }
 0x198   :  { %1371 = vmatprep.subr.bf16.mxu0 %v1541_v9  ;;  %1395 = vmatprep.subr.bf16.mxu1 %v1541_v9 }
 0x19b   :  { %1373 = vmatpush3.bf16.msra.mxu0 %v1693_v7  ;;  %1397 = vmatpush3.bf16.msra.mxu1 %v1695_v11 }
 0x19c   :  { %1374 = vmatprep.subr.bf16.mxu0 %v1541_v9  ;;  %1398 = vmatprep.subr.bf16.mxu1 %v1541_v9 }
 0x19f   :  { %1376 = vmatpush3.bf16.msra.mxu0 %v1701_v16  ;;  %1400 = vmatpush3.bf16.msra.mxu1 %v1703_v20 }
 0x1a0   :  { %1401 = vmatprep.subr.bf16.mxu0 %v1541_v9  ;;  %1425 = vmatprep.subr.bf16.mxu1 %v1541_v9 }
 0x1a2   :  { %1150 = vmatmul.mubr.f32.vlgmr.msra.gmra.mrb[4].mxu0 %v477_v55  ;;  %1185 = vmatmul.mubr.f32.vlgmr.msra.gmra.mrb[4].mxu1 %v460_v56 }
 0x1a3   :  { %1403 = vmatpush3.bf16.msra.mxu0 %v1613_v10  ;;  %1427 = vmatpush3.bf16.msra.mxu1 %v1615_v14 }
 0x1a4   :  { %1404 = vmatprep.subr.bf16.mxu0 %v1541_v9  ;;  %1428 = vmatprep.subr.bf16.mxu1 %v1541_v9 }
 0x1a5   :  { %1219 = vmatprep.mubr.msk.f32.mxu0 %vm1542_vm0, %v1543_v21  ;;  %1254 = vmatprep.mubr.msk.f32.mxu1 %vm1542_vm0, %v1543_v21 }
 0x1a7   :  { %1406 = vmatpush3.bf16.msra.mxu0 %v1618_v17  ;;  %1430 = vmatpush3.bf16.msra.mxu1 %v1622_v18 }
 0x1a8   :  { %1407 = vmatprep.subr.bf16.mxu0 %v1541_v9  ;;  %1431 = vmatprep.subr.bf16.mxu1 %v1541_v9 }
 0x1ab   :  { %1409 = vmatpush3.bf16.msra.mxu0 %v1626_v23  ;;  %1433 = vmatpush3.bf16.msra.mxu1 %v1630_v24 }
 0x1ac   :  { %1410 = vmatprep.subr.bf16.mxu0 %v1541_v9  ;;  %1434 = vmatprep.subr.bf16.mxu1 %v1541_v9 }
 0x1af   :  { %1412 = vmatpush3.bf16.msra.mxu0 %v1634_v29  ;;  %1436 = vmatpush3.bf16.msra.mxu1 %v1638_v30  ;;  %v840_v30 = vld [vmem:[%s1848_s2] ss:$0 sm:$0xff]  ;;  %s1544_s2 = smov [#allocation7]  }
 0x1b0   :  { %1413 = vmatprep.subr.bf16.mxu0 %v1541_v9  ;;  %1437 = vmatprep.subr.bf16.mxu1 %v1541_v9  ;;  %s830_s11 = sshll.u32 %s1544_s2, 4  ;;  %s831_s11 = int_to_ptr.vmem [resolvable:$true] %s830_s11 }
 0x1b1   :  { %s1509_s12 = scalar_lea.vmem %s831_s11, 512  ;;  %p1514_p3 = scmp.lt.s32.totalorder %s831_s11, %s831_s11 }
 0x1b2   :  { %p1510_p2 = scmp.ne.s32.totalorder %s831_s11, %s1509_s12  ;;  %p1515_p4 = scmp.lt.s32.totalorder %s1509_s12, %s1509_s12 }
 0x1b3   :  { %1415 = vmatpush3.bf16.msra.mxu0 %v1677_v59  ;;  %1439 = vmatpush3.bf16.msra.mxu1 %v1679_v61 }
 0x1b4   :  { %1416 = vmatprep.subr.bf16.mxu0 %v1541_v9  ;;  %1440 = vmatprep.subr.bf16.mxu1 %v1541_v9  ;;  %p1516_p5 = por %p1515_p4, %p1514_p3 }
 0x1b6   :  { %p1517_p6 = pnand %p1516_p5, %p1510_p2 }
 0x1b7   :  { %1418 = vmatpush3.bf16.msra.mxu0 %v1685_v1  ;;  %1442 = vmatpush3.bf16.msra.mxu1 %v1687_v3 }
 0x1b8   :  { %1419 = vmatprep.subr.bf16.mxu0 %v1541_v9  ;;  %1443 = vmatprep.subr.bf16.mxu1 %v1541_v9 }
 0x1bb   :  { %1421 = vmatpush3.bf16.msra.mxu0 %v1693_v7  ;;  %1445 = vmatpush3.bf16.msra.mxu1 %v1695_v11 }
 0x1bc   :  { %1422 = vmatprep.subr.bf16.mxu0 %v1541_v9  ;;  %1446 = vmatprep.subr.bf16.mxu1 %v1541_v9 }
 0x1bf   :  { %1424 = vmatpush3.bf16.msra.mxu0 %v1701_v16  ;;  %1448 = vmatpush3.bf16.msra.mxu1 %v1703_v20 }
 0x1e8   :  { %v644_v10 = vpop.xlane.xlu1 %643 }
 0x1e9   :  { %v645_v14 = vadd.f32 %v644_v10, %v644_v10 }
 0x1eb   :  { %v646_v17 = vmul.f32 0.00390625, %v645_v14 }
 0x1ed   :  { %v647_v18 = vadd.f32 1e-05, %v646_v17 }
 0x1ef   :  { %1463 = vrsqrt.f32 %v647_v18 }
 0x1f9   :  { %v1464_v23 = vpop.eup %1463 }
 0x1fa   :  { %v649_v24 = vmul.f32 %v1464_v23, %v1714_v34 }
 0x1fc   :  { %1220 = vmatmul.mubr.f32.vlgmr.msra.gmra.mrb[6].mxu0 %v649_v24  ;;  %1255 = vmatmul.mubr.f32.vlgmr.msra.gmra.mrb[6].mxu1 %v649_v24 }
 0x235   :  { %v162_v29 = vpop.f32.mrb[0].mxu0  ;;  %v232_v9 = vpop.f32.mrb[0].mxu1 }
 0x236   :  { %v233_v50 = vadd.f32 %v232_v9, %v162_v29  ;;  %v1011_v52 = vpop.f32.mrb[1].mxu0  ;;  %v1046_v57 = vpop.f32.mrb[1].mxu1 }
 0x238   :  { %v242_v58 = vadd.f32 %v840_v30, %v233_v50 }
 0x23a   :  { %243 = vst [vmem:[#allocation7] sm:$0xff] %v242_v58 }
 0x255   :  { %v364_v59 = vpop.f32.mrb[2].mxu0  ;;  %v434_v60 = vpop.f32.mrb[2].mxu1 }
 0x256   :  { %v435_v61 = vadd.f32 %v434_v60, %v364_v59  ;;  %v1081_v62 = vpop.f32.mrb[3].mxu0  ;;  %v1116_v63 = vpop.f32.mrb[3].mxu1 }
 0x258   :  { %v438_v0 = vadd.f32 %v840_v30, %v435_v61 }
 0x25a   :  { %439 = vst [vmem:[#allocation7 + $0x8] sm:$0xff] %v438_v0 }
 0x275   :  { %v560_v1 = vpop.f32.mrb[4].mxu0  ;;  %v630_v2 = vpop.f32.mrb[4].mxu1 }
 0x276   :  { %v631_v3 = vadd.f32 %v630_v2, %v560_v1  ;;  %v1151_v4 = vpop.f32.mrb[5].mxu0  ;;  %v1186_v5 = vpop.f32.mrb[5].mxu1 }
 0x278   :  { %v634_v6 = vadd.f32 %v840_v30, %v631_v3 }
 0x27a   :  { %635 = vst [vmem:[#allocation7 + $0x10] sm:$0xff] %v634_v6 }
 0x2cf   :  { %v748_v7 = vpop.f32.mrb[6].mxu0  ;;  %v818_v8 = vpop.f32.mrb[6].mxu1 }
 0x2d0   :  { %v819_v11 = vadd.f32 %v818_v8, %v748_v7  ;;  %v1221_v12 = vpop.f32.mrb[7].mxu0  ;;  %v1256_v13 = vpop.f32.mrb[7].mxu1 }
 0x2d2   :  { %v822_v15 = vadd.f32 %v840_v30, %v819_v11 }
 0x2d4   :  { %823 = vst [vmem:[#allocation7 + $0x18] sm:$0xff] %v822_v15 }
 0x2d5   :  { %1520 = shalt.err (!%p1517_p6)
}
 0x2d6   :  { %s1521_s15 = scalar_lea.hbm %s1849_s3, 512 }
 0x2d7   :  { %p1522_p7 = scmp.ne.s32.totalorder %s1849_s3, %s1521_s15  ;;  %p1525_p8 = scmp.lt.u32.totalorder %s1521_s15, %s1849_s3 }
 0x2d9   :  { %p1527_p9 = pnand %p1525_p8, %p1522_p7 }
 0x2db   :  { %1530 = shalt.err (!%p1527_p9)
}
 0x2dc   :  { %833 = dma.vmem_to_hbm [thread:$0]  %s831_s11, 512, %s1849_s3, [#allocation4]  }
 0x2dd   :  { %1535 = dma.done.wait [#allocation4], 512  }
 0x2de   :  { %1536 = vsyncadd [#allocation4], 4294966784 }
 0x2df   :  { %837 = vsyncpa [#allocation3], 1 }
 0x2e0   :  { %838 = vsyncpa [#allocation6], 1 }
 0x2e1   :  { %839 = vsyncpa [#allocation4], 1 }

</bundles_post_ra>
